<compile_context>
chip_gen: v7x
topology: tpu7x:2x2x1
jax: 0.10.0
libtpu: 0.0.40
codegen_flags: <defaults>
</compile_context>

<pallas_src>
import functools

import jax
import jax.numpy as jnp
from jax.experimental import pallas as pl
from jax.experimental.pallas import tpu as pltpu


def _round_up(x, m):
    return (x + m - 1) // m * m


def attention_decoder_kernel(
    emb_ref,      # [B, Ep]        bf16  embedded input token
    h_ref,        # [B, Hp]        f32   previous hidden state
    enc_ref,      # [B, Tp, Hp]    bf16  encoder outputs (attention memory)
    mask_ref,     # [B, Tp]        f32   additive attention mask (0 / -1e30)
    wih_ref,      # [Ep, 3Hp]      bf16  GRU input->gates weight (pre-transposed)
    whh_ref,      # [Hp, 3Hp]      bf16  GRU hidden->gates weight (pre-transposed)
    bih_ref,      # [1, 3Hp]       f32
    bhh_ref,      # [1, 3Hp]       f32
    wout_ref,     # [2Hp, TILE_V]  bf16  output projection tile (streamed)
    bout_ref,     # [1, TILE_V]    f32   (-1e30 on padded vocab lanes)
    logits_ref,   # out [B, TILE_V] f32  unnormalized logits for this vocab tile
    lse_ref,      # out [B, 1]      f32  logsumexp over the whole vocab
    hid_ref,      # out [B, Hp]     f32  new hidden state
    attn_ref,     # out [B, Tp]     f32  attention weights
    cat_ref,      # scratch VMEM [B, 2Hp] bf16   concat(h_new, context)
    m_ref,        # scratch VMEM [B, 1]   f32    running max
    s_ref,        # scratch VMEM [B, 1]   f32    running sum(exp)
    *,
    hidden_pad: int,
):
    j = pl.program_id(0)
    Hp = hidden_pad
    bf16 = jnp.bfloat16

    # ---- GRU cell + attention: computed once, on the first vocab tile ----
    @pl.when(j == 0)
    def _first_tile():
        x = emb_ref[...]                                  # bf16 [B, Ep]
        h = h_ref[...]                                    # f32  [B, Hp]

        gi = jnp.dot(x, wih_ref[...],
                     preferred_element_type=jnp.float32) + bih_ref[...]
        gh = jnp.dot(h.astype(bf16), whh_ref[...],
                     preferred_element_type=jnp.float32) + bhh_ref[...]

        # PyTorch GRU gate order: r, z, n ; gate blocks are 128-lane aligned.
        r = jax.nn.sigmoid(gi[:, 0:Hp] + gh[:, 0:Hp])
        z = jax.nn.sigmoid(gi[:, Hp:2 * Hp] + gh[:, Hp:2 * Hp])
        n = jnp.tanh(gi[:, 2 * Hp:3 * Hp] + r * gh[:, 2 * Hp:3 * Hp])
        h_new = (1.0 - z) * n + z * h                     # f32 [B, Hp]

        # ---- dot-attention scores on the MXU (contract over H) ----
        enc = enc_ref[...]                                # bf16 [B, Tp, Hp]
        h_b = h_new.astype(bf16)[:, None, :]              # [B, 1, Hp]
        scores = jnp.einsum("bqh,bth->bqt", h_b, enc,
                            preferred_element_type=jnp.float32)[:, 0, :]  # [B, Tp]
        scores = scores + mask_ref[...]                   # seq_len / pad masking
        scores = scores - jnp.max(scores, axis=-1, keepdims=True)
        e = jnp.exp(scores)
        w = e * pl.reciprocal(jnp.sum(e, axis=-1, keepdims=True), approx=True)

        # ---- context = weights @ encoder_outputs on the MXU (contract over T) ----
        w_b = w.astype(bf16)[:, None, :]                  # [B, 1, Tp]
        context = jnp.einsum("bqt,bth->bqh", w_b, enc,
                             preferred_element_type=jnp.float32)[:, 0, :]  # [B, Hp]

        hid_ref[...] = h_new
        attn_ref[...] = w
        cat_ref[:, 0:Hp] = h_new.astype(bf16)
        cat_ref[:, Hp:2 * Hp] = context.astype(bf16)
        m_ref[...] = jnp.full_like(m_ref, -1e30)
        s_ref[...] = jnp.zeros_like(s_ref)

    # ---- per-vocab-tile output projection: one fused [B,2Hp]@[2Hp,TILE_V] ----
    logits = jnp.dot(cat_ref[...], wout_ref[...],
                     preferred_element_type=jnp.float32) + bout_ref[...]
    logits_ref[...] = logits

    # ---- online logsumexp across vocab tiles ----
    m_prev = m_ref[...]
    m_new = jnp.maximum(m_prev, jnp.max(logits, axis=-1, keepdims=True))
    s_ref[...] = s_ref[...] * jnp.exp(m_prev - m_new) + jnp.sum(
        jnp.exp(logits - m_new), axis=-1, keepdims=True)
    m_ref[...] = m_new

    @pl.when(j == pl.num_programs(0) - 1)
    def _last_tile():
        lse_ref[...] = m_ref[...] + jnp.log(s_ref[...])


def attention_decoder_step(token_ids, prev_hidden, encoder_outputs, params,
                           seq_len=None):
    """One decode step. Returns (log_probs [B,V], hidden [B,H], weights [B,T])."""
    B, H = prev_hidden.shape
    T = encoder_outputs.shape[1]
    E = params["embedding"].shape[1]
    V = params["w_out"].shape[1]

    f32, bf16 = jnp.float32, jnp.bfloat16

    # Lane-dense padding of every feature dim.
    Hp = _round_up(H, 128)
    Ep = _round_up(E, 128)
    Tp = _round_up(T, 128)
    TILE_V = min(512, _round_up(V, 128))
    Vp = _round_up(V, TILE_V)
    nV = Vp // TILE_V

    # Embedding lookup (gather) stays in plain-JAX glue; cast to bf16 for MXU.
    embedded = jnp.take(params["embedding"], token_ids, axis=0)        # [B, E]
    emb_p = jnp.zeros((B, Ep), bf16).at[:, :E].set(embedded.astype(bf16))

    h_p = jnp.zeros((B, Hp), f32).at[:, :H].set(prev_hidden.astype(f32))
    enc_p = jnp.zeros((B, Tp, Hp), bf16).at[:, :T, :H].set(
        encoder_outputs.astype(bf16))

    # Additive attention mask: 0 on valid timesteps, -1e30 on pad / >= seq_len
    # (this is mask_3d(..., -inf) from the reference module).
    t_idx = jnp.arange(Tp, dtype=jnp.int32)[None, :]
    if seq_len is None:
        valid = jnp.full((B,), T, jnp.int32)
    else:
        valid = jnp.asarray(seq_len, jnp.int32)
    attn_mask = jnp.where(t_idx < valid[:, None], 0.0, -1e30).astype(f32)

    # GRU weights: pad each gate block so gate slices are 128-lane aligned.
    def pad_gate_weight(w, in_dim, in_pad):               # [in_dim,3H] -> [in_pad,3Hp]
        out = jnp.zeros((in_pad, 3 * Hp), bf16)
        for g in range(3):
            out = out.at[:in_dim, g * Hp:g * Hp + H].set(
                w[:, g * H:(g + 1) * H].astype(bf16))
        return out

    def pad_gate_bias(b):                                 # [1,3H] -> [1,3Hp]
        out = jnp.zeros((1, 3 * Hp), f32)
        for g in range(3):
            out = out.at[:, g * Hp:g * Hp + H].set(
                b[:, g * H:(g + 1) * H].astype(f32))
        return out

    wih_p = pad_gate_weight(params["w_ih"], E, Ep)
    whh_p = pad_gate_weight(params["w_hh"], H, Hp)
    bih_p = pad_gate_bias(params["b_ih"])
    bhh_p = pad_gate_bias(params["b_hh"])

    # Output projection [2H,V] -> [2Hp,Vp]; padded vocab lanes get a -1e30 bias
    # so they contribute nothing to the logsumexp.
    w_out = params["w_out"]
    wout_p = jnp.zeros((2 * Hp, Vp), bf16)
    wout_p = wout_p.at[0:H, :V].set(w_out[0:H, :].astype(bf16))
    wout_p = wout_p.at[Hp:Hp + H, :V].set(w_out[H:2 * H, :].astype(bf16))
    bout_p = jnp.full((1, Vp), -1e30, f32).at[:, :V].set(
        params["b_out"].astype(f32))

    kernel = functools.partial(attention_decoder_kernel, hidden_pad=Hp)

    grid_spec = pltpu.PrefetchScalarGridSpec(
        num_scalar_prefetch=0,
        grid=(nV,),
        in_specs=[
            pl.BlockSpec((B, Ep), lambda j: (0, 0)),          # embedded
            pl.BlockSpec((B, Hp), lambda j: (0, 0)),          # prev hidden
            pl.BlockSpec((B, Tp, Hp), lambda j: (0, 0, 0)),   # encoder outputs
            pl.BlockSpec((B, Tp), lambda j: (0, 0)),          # attention mask
            pl.BlockSpec((Ep, 3 * Hp), lambda j: (0, 0)),     # w_ih
            pl.BlockSpec((Hp, 3 * Hp), lambda j: (0, 0)),     # w_hh
            pl.BlockSpec((1, 3 * Hp), lambda j: (0, 0)),      # b_ih
            pl.BlockSpec((1, 3 * Hp), lambda j: (0, 0)),      # b_hh
            pl.BlockSpec((2 * Hp, TILE_V), lambda j: (0, j)),  # w_out (streamed)
            pl.BlockSpec((1, TILE_V), lambda j: (0, j)),       # b_out (streamed)
        ],
        out_specs=[
            pl.BlockSpec((B, TILE_V), lambda j: (0, j)),      # unnormalized logits
            pl.BlockSpec((B, 1), lambda j: (0, 0)),           # logsumexp
            pl.BlockSpec((B, Hp), lambda j: (0, 0)),          # new hidden
            pl.BlockSpec((B, Tp), lambda j: (0, 0)),          # attention weights
        ],
        scratch_shapes=[
            pltpu.VMEM((B, 2 * Hp), bf16),                    # concat(h_new, context)
            pltpu.VMEM((B, 1), f32),                          # running max
            pltpu.VMEM((B, 1), f32),                          # running sum(exp)
        ],
    )

    logits, lse, hid_p, attn_p = pl.pallas_call(
        kernel,
        out_shape=(
            jax.ShapeDtypeStruct((B, Vp), f32),
            jax.ShapeDtypeStruct((B, 1), f32),
            jax.ShapeDtypeStruct((B, Hp), f32),
            jax.ShapeDtypeStruct((B, Tp), f32),
        ),
        grid_spec=grid_spec,
        compiler_params=pltpu.CompilerParams(
            dimension_semantics=("arbitrary",),
            vmem_limit_bytes=64 * 1024 * 1024,
        ),
    )(emb_p, h_p, enc_p, attn_mask, wih_p, whh_p, bih_p, bhh_p, wout_p, bout_p)

    # log_softmax = logits - logsumexp (lse produced in-kernel; exact identity).
    log_probs = logits[:, :V] - lse
    return log_probs, hid_p[:, :H], attn_p[:, :T]


def init_params(key, n_classes, hidden_size, embedding_dim):
    """Deterministic synthetic parameters (shapes match the PyTorch module)."""
    ks = jax.random.split(key, 7)
    s = 0.1
    emb = jax.random.normal(ks[0], (n_classes, embedding_dim), jnp.float32) * s
    emb = emb.at[0].set(0.0)  # padding_idx=0
    return {
        "embedding": emb,                                                        # [V, E]
        "w_ih": jax.random.normal(ks[1], (embedding_dim, 3 * hidden_size)) * s,  # [E, 3H]
        "w_hh": jax.random.normal(ks[2], (hidden_size, 3 * hidden_size)) * s,    # [H, 3H]
        "b_ih": jax.random.normal(ks[3], (1, 3 * hidden_size)) * s,              # [1, 3H]
        "b_hh": jax.random.normal(ks[4], (1, 3 * hidden_size)) * s,              # [1, 3H]
        "w_out": jax.random.normal(ks[5], (2 * hidden_size, n_classes)) * s,     # [2H, V]
        "b_out": jax.random.normal(ks[6], (1, n_classes)) * s,                   # [1, V]
    }


def reference_step(token_ids, prev_hidden, encoder_outputs, params):
    """Pure-JAX f32 reference of the PyTorch forward (seq_len=None)."""
    H = prev_hidden.shape[1]
    x = jnp.take(params["embedding"], token_ids, axis=0)
    gi = x @ params["w_ih"] + params["b_ih"]
    gh = prev_hidden @ params["w_hh"] + params["b_hh"]
    r = jax.nn.sigmoid(gi[:, :H] + gh[:, :H])
    z = jax.nn.sigmoid(gi[:, H:2 * H] + gh[:, H:2 * H])
    n = jnp.tanh(gi[:, 2 * H:] + r * gh[:, 2 * H:])
    h_new = (1.0 - z) * n + z * prev_hidden
    scores = jnp.einsum("bth,bh->bt", encoder_outputs, h_new)
    w = jax.nn.softmax(scores, axis=-1)
    ctx = jnp.einsum("bt,bth->bh", w, encoder_outputs)
    logits = jnp.concatenate([h_new, ctx], axis=-1) @ params["w_out"] + params["b_out"]
    return jax.nn.log_softmax(logits, axis=-1), h_new, w


if __name__ == "__main__":
    B, T, H, V = 2, 8, 32, 32  # batch, max_time, decoder_hidden, n_classes

    key = jax.random.PRNGKey(0)
    k_tok, k_hid, k_enc, k_par = jax.random.split(key, 4)

    token_ids = jax.random.randint(k_tok, (B,), 0, V, dtype=jnp.int32)       # input [B]
    prev_hidden = jax.random.normal(k_hid, (B, H), jnp.float32)              # prev_hidden [B, H]
    encoder_outputs = jax.random.normal(k_enc, (B, T, H), jnp.float32)       # encoder_outputs [B, T, H]
    params = init_params(k_par, V, H, H)

    log_probs, hidden, weights = attention_decoder_step(
        token_ids, prev_hidden, encoder_outputs, params
    )
    jax.block_until_ready((log_probs, hidden, weights))

    assert log_probs.shape == (B, V)
    assert hidden.shape == (B, H)
    assert weights.shape == (B, T)
    # Attention weights sum to 1 (approx reciprocal -> relaxed tolerance);
    # exp(log_probs) sums to 1 per row.
    assert jnp.allclose(jnp.sum(weights, axis=-1), 1.0, atol=2e-3)
    assert jnp.allclose(jnp.sum(jnp.exp(log_probs), axis=-1), 1.0, atol=1e-3)

    # Compare against pure-JAX f32 reference (loose tolerance: bf16 MXU operands).
    ref_lp, ref_h, ref_w = reference_step(token_ids, prev_hidden, encoder_outputs, params)
    assert jnp.max(jnp.abs(log_probs - ref_lp)) < 0.15
    assert jnp.max(jnp.abs(hidden - ref_h)) < 0.1
    assert jnp.max(jnp.abs(weights - ref_w)) < 0.1

    print("KERNEL_OK")
</pallas_src>

<mosaic_0001>
module attributes {stable_mosaic.version = 11 : i64} {
  func.func @attention_decoder_kernel(%arg0: i32, %arg1: memref<2x128xbf16, #tpu.memory_space<vmem>>, %arg2: memref<2x128xf32, #tpu.memory_space<vmem>>, %arg3: memref<2x128x128xbf16, #tpu.memory_space<vmem>>, %arg4: memref<2x128xf32, #tpu.memory_space<vmem>>, %arg5: memref<128x384xbf16, #tpu.memory_space<vmem>>, %arg6: memref<128x384xbf16, #tpu.memory_space<vmem>>, %arg7: memref<1x384xf32, #tpu.memory_space<vmem>>, %arg8: memref<1x384xf32, #tpu.memory_space<vmem>>, %arg9: memref<256x128xbf16, #tpu.memory_space<vmem>>, %arg10: memref<1x128xf32, #tpu.memory_space<vmem>>, %arg11: memref<2x128xf32, #tpu.memory_space<vmem>>, %arg12: memref<2x1xf32, #tpu.memory_space<vmem>>, %arg13: memref<2x128xf32, #tpu.memory_space<vmem>>, %arg14: memref<2x128xf32, #tpu.memory_space<vmem>>, %arg15: memref<2x256xbf16, #tpu.memory_space<vmem>>, %arg16: memref<2x1xf32, #tpu.memory_space<vmem>>, %arg17: memref<2x1xf32, #tpu.memory_space<vmem>>) attributes {dimension_semantics = [#tpu.dimension_semantics<arbitrary>], iteration_bounds = array<i64: 1>, scalar_prefetch = 0 : i64, scratch_operands = 3 : i64, tpu.core_type = #tpu.core_type<tc>, window_params = [{pipeline_mode = #tpu.pipeline_mode<synchronous>, transform_indices = @transform_0, window_bounds = array<i64: 2, 128>}, {pipeline_mode = #tpu.pipeline_mode<synchronous>, transform_indices = @transform_1, window_bounds = array<i64: 2, 128>}, {pipeline_mode = #tpu.pipeline_mode<synchronous>, transform_indices = @transform_2, window_bounds = array<i64: 2, 128, 128>}, {pipeline_mode = #tpu.pipeline_mode<synchronous>, transform_indices = @transform_3, window_bounds = array<i64: 2, 128>}, {pipeline_mode = #tpu.pipeline_mode<synchronous>, transform_indices = @transform_4, window_bounds = array<i64: 128, 384>}, {pipeline_mode = #tpu.pipeline_mode<synchronous>, transform_indices = @transform_5, window_bounds = array<i64: 128, 384>}, {pipeline_mode = #tpu.pipeline_mode<synchronous>, transform_indices = @transform_6, window_bounds = array<i64: 1, 384>}, {pipeline_mode = #tpu.pipeline_mode<synchronous>, transform_indices = @transform_7, window_bounds = array<i64: 1, 384>}, {transform_indices = @transform_8, window_bounds = array<i64: 256, 128>}, {transform_indices = @transform_9, window_bounds = array<i64: 1, 128>}, {transform_indices = @transform_10, window_bounds = array<i64: 2, 128>}, {pipeline_mode = #tpu.pipeline_mode<synchronous>, transform_indices = @transform_11, window_bounds = array<i64: 2, 1>}, {pipeline_mode = #tpu.pipeline_mode<synchronous>, transform_indices = @transform_12, window_bounds = array<i64: 2, 128>}, {pipeline_mode = #tpu.pipeline_mode<synchronous>, transform_indices = @transform_13, window_bounds = array<i64: 2, 128>}]} {
    %c0_i32 = arith.constant 0 : i32
    %0 = arith.cmpi eq, %arg0, %c0_i32 : i32
    %1 = arith.extui %0 : i1 to i32
    %c0_i32_0 = arith.constant 0 : i32
    %2 = arith.cmpi ne, %1, %c0_i32_0 : i32
    scf.if %2 {
      %c0_20 = arith.constant 0 : index
      %c0_21 = arith.constant 0 : index
      %29 = vector.load %arg1[%c0_20, %c0_21] : memref<2x128xbf16, #tpu.memory_space<vmem>>, vector<2x128xbf16>
      %c0_22 = arith.constant 0 : index
      %c0_23 = arith.constant 0 : index
      %30 = vector.load %arg2[%c0_22, %c0_23] : memref<2x128xf32, #tpu.memory_space<vmem>>, vector<2x128xf32>
      %c0_24 = arith.constant 0 : index
      %c0_25 = arith.constant 0 : index
      %31 = vector.load %arg5[%c0_24, %c0_25] : memref<128x384xbf16, #tpu.memory_space<vmem>>, vector<128x384xbf16>
      %cst_26 = arith.constant dense<0.000000e+00> : vector<2x384xf32>
      %32 = tpu.matmul %29, %31, %cst_26 {dimension_numbers = #tpu.dot_dimension_numbers<[1], [0], [0], [1], [0, 0, 1, 1], [], []>} : vector<2x128xbf16>, vector<128x384xbf16>, vector<2x384xf32> -> vector<2x384xf32>
      %c0_27 = arith.constant 0 : index
      %c0_28 = arith.constant 0 : index
      %33 = vector.load %arg7[%c0_27, %c0_28] : memref<1x384xf32, #tpu.memory_space<vmem>>, vector<1x384xf32>
      %34 = vector.broadcast %33 : vector<1x384xf32> to vector<2x384xf32>
      %35 = arith.addf %32, %34 : vector<2x384xf32>
      %36 = arith.truncf %30 : vector<2x128xf32> to vector<2x128xbf16>
      %c0_29 = arith.constant 0 : index
      %c0_30 = arith.constant 0 : index
      %37 = vector.load %arg6[%c0_29, %c0_30] : memref<128x384xbf16, #tpu.memory_space<vmem>>, vector<128x384xbf16>
      %cst_31 = arith.constant dense<0.000000e+00> : vector<2x384xf32>
      %38 = tpu.matmul %36, %37, %cst_31 {dimension_numbers = #tpu.dot_dimension_numbers<[1], [0], [0], [1], [0, 0, 1, 1], [], []>} : vector<2x128xbf16>, vector<128x384xbf16>, vector<2x384xf32> -> vector<2x384xf32>
      %c0_32 = arith.constant 0 : index
      %c0_33 = arith.constant 0 : index
      %39 = vector.load %arg8[%c0_32, %c0_33] : memref<1x384xf32, #tpu.memory_space<vmem>>, vector<1x384xf32>
      %40 = vector.broadcast %39 : vector<1x384xf32> to vector<2x384xf32>
      %41 = arith.addf %38, %40 : vector<2x384xf32>
      %42 = vector.extract_strided_slice %35 {offsets = [0, 0], sizes = [2, 128], strides = [1, 1]} : vector<2x384xf32> to vector<2x128xf32>
      %43 = vector.extract_strided_slice %41 {offsets = [0, 0], sizes = [2, 128], strides = [1, 1]} : vector<2x384xf32> to vector<2x128xf32>
      %44 = arith.addf %42, %43 : vector<2x128xf32>
      %45 = arith.negf %44 : vector<2x128xf32>
      %46 = math.exp %45 : vector<2x128xf32>
      %cst_34 = arith.constant 1.000000e+00 : f32
      %47 = vector.broadcast %cst_34 : f32 to vector<2x128xf32>
      %48 = arith.addf %47, %46 : vector<2x128xf32>
      %49 = arith.divf %47, %48 : vector<2x128xf32>
      %50 = vector.extract_strided_slice %35 {offsets = [0, 128], sizes = [2, 128], strides = [1, 1]} : vector<2x384xf32> to vector<2x128xf32>
      %51 = vector.extract_strided_slice %41 {offsets = [0, 128], sizes = [2, 128], strides = [1, 1]} : vector<2x384xf32> to vector<2x128xf32>
      %52 = arith.addf %50, %51 : vector<2x128xf32>
      %53 = arith.negf %52 : vector<2x128xf32>
      %54 = math.exp %53 : vector<2x128xf32>
      %cst_35 = arith.constant 1.000000e+00 : f32
      %55 = vector.broadcast %cst_35 : f32 to vector<2x128xf32>
      %56 = arith.addf %55, %54 : vector<2x128xf32>
      %57 = arith.divf %55, %56 : vector<2x128xf32>
      %58 = vector.extract_strided_slice %35 {offsets = [0, 256], sizes = [2, 128], strides = [1, 1]} : vector<2x384xf32> to vector<2x128xf32>
      %59 = vector.extract_strided_slice %41 {offsets = [0, 256], sizes = [2, 128], strides = [1, 1]} : vector<2x384xf32> to vector<2x128xf32>
      %60 = arith.mulf %49, %59 : vector<2x128xf32>
      %61 = arith.addf %58, %60 : vector<2x128xf32>
      %62 = math.tanh %61 : vector<2x128xf32>
      %cst_36 = arith.constant 1.000000e+00 : f32
      %63 = vector.broadcast %cst_36 : f32 to vector<2x128xf32>
      %64 = arith.subf %63, %57 : vector<2x128xf32>
      %65 = arith.mulf %64, %62 : vector<2x128xf32>
      %66 = arith.mulf %57, %30 : vector<2x128xf32>
      %67 = arith.addf %65, %66 : vector<2x128xf32>
      %c0_37 = arith.constant 0 : index
      %c0_38 = arith.constant 0 : index
      %c0_39 = arith.constant 0 : index
      %68 = vector.load %arg3[%c0_37, %c0_38, %c0_39] : memref<2x128x128xbf16, #tpu.memory_space<vmem>>, vector<2x128x128xbf16>
      %69 = arith.truncf %67 : vector<2x128xf32> to vector<2x128xbf16>
      %70 = vector.shape_cast %69 : vector<2x128xbf16> to vector<2x1x128xbf16>
      "tpu.trace_start"() <{level = 10 : i32, message = "bqh,bth->bqt"}> : () -> ()
      %cst_40 = arith.constant dense<0.000000e+00> : vector<2x1x128xf32>
      %71 = tpu.matmul %70, %68, %cst_40 {dimension_numbers = #tpu.dot_dimension_numbers<[2], [2], [1], [1], [0, 0, 0, 1, 1, 1], [0], [0]>} : vector<2x1x128xbf16>, vector<2x128x128xbf16>, vector<2x1x128xf32> -> vector<2x1x128xf32>
      "tpu.trace_stop"() : () -> ()
      %72 = vector.shape_cast %71 : vector<2x1x128xf32> to vector<2x128xf32>
      %c0_41 = arith.constant 0 : index
      %c0_42 = arith.constant 0 : index
      %73 = vector.load %arg4[%c0_41, %c0_42] : memref<2x128xf32, #tpu.memory_space<vmem>>, vector<2x128xf32>
      %74 = arith.addf %72, %73 : vector<2x128xf32>
      %cst_43 = arith.constant dense<0xFF800000> : vector<2xf32>
      %75 = vector.multi_reduction <maximumf>, %74, %cst_43 [1] : vector<2x128xf32> to vector<2xf32>
      %76 = vector.shape_cast %75 : vector<2xf32> to vector<2x1xf32>
      %77 = vector.broadcast %76 : vector<2x1xf32> to vector<2x128xf32>
      %78 = arith.subf %74, %77 : vector<2x128xf32>
      %79 = math.exp %78 : vector<2x128xf32>
      %cst_44 = arith.constant dense<0.000000e+00> : vector<2xf32>
      %80 = vector.multi_reduction <add>, %79, %cst_44 [1] : vector<2x128xf32> to vector<2xf32>
      %81 = vector.shape_cast %80 : vector<2xf32> to vector<2x1xf32>
      %82 = tpu.reciprocal %81 {approx = true} : vector<2x1xf32> -> vector<2x1xf32>
      %83 = vector.broadcast %82 : vector<2x1xf32> to vector<2x128xf32>
      %84 = arith.mulf %79, %83 : vector<2x128xf32>
      %85 = arith.truncf %84 : vector<2x128xf32> to vector<2x128xbf16>
      %86 = vector.shape_cast %85 : vector<2x128xbf16> to vector<2x1x128xbf16>
      "tpu.trace_start"() <{level = 10 : i32, message = "bqt,bth->bqh"}> : () -> ()
      %cst_45 = arith.constant dense<0.000000e+00> : vector<2x1x128xf32>
      %87 = tpu.matmul %86, %68, %cst_45 {dimension_numbers = #tpu.dot_dimension_numbers<[2], [1], [1], [2], [0, 0, 0, 1, 1, 2], [0], [0]>} : vector<2x1x128xbf16>, vector<2x128x128xbf16>, vector<2x1x128xf32> -> vector<2x1x128xf32>
      "tpu.trace_stop"() : () -> ()
      %88 = vector.shape_cast %87 : vector<2x1x128xf32> to vector<2x128xf32>
      %c0_46 = arith.constant 0 : index
      %c0_47 = arith.constant 0 : index
      %89 = vector.load %arg13[%c0_46, %c0_47] : memref<2x128xf32, #tpu.memory_space<vmem>>, vector<2x128xf32>
      tpu.vector_store %arg13[%c0_46, %c0_47], %67 {strides = array<i32>} : memref<2x128xf32, #tpu.memory_space<vmem>>, vector<2x128xf32>,
      %c0_48 = arith.constant 0 : index
      %c0_49 = arith.constant 0 : index
      %90 = vector.load %arg14[%c0_48, %c0_49] : memref<2x128xf32, #tpu.memory_space<vmem>>, vector<2x128xf32>
      tpu.vector_store %arg14[%c0_48, %c0_49], %84 {strides = array<i32>} : memref<2x128xf32, #tpu.memory_space<vmem>>, vector<2x128xf32>,
      %91 = arith.truncf %67 : vector<2x128xf32> to vector<2x128xbf16>
      %c0_50 = arith.constant 0 : index
      %c0_51 = arith.constant 0 : index
      %92 = vector.load %arg15[%c0_50, %c0_51] : memref<2x256xbf16, #tpu.memory_space<vmem>>, vector<2x128xbf16>
      tpu.vector_store %arg15[%c0_50, %c0_51], %91 {strides = array<i32>} : memref<2x256xbf16, #tpu.memory_space<vmem>>, vector<2x128xbf16>,
      %93 = arith.truncf %88 : vector<2x128xf32> to vector<2x128xbf16>
      %c0_52 = arith.constant 0 : index
      %c128 = arith.constant 128 : index
      %94 = vector.load %arg15[%c0_52, %c128] : memref<2x256xbf16, #tpu.memory_space<vmem>>, vector<2x128xbf16>
      tpu.vector_store %arg15[%c0_52, %c128], %93 {strides = array<i32>} : memref<2x256xbf16, #tpu.memory_space<vmem>>, vector<2x128xbf16>,
      %cst_53 = arith.constant -1.000000e+30 : f32
      %95 = vector.broadcast %cst_53 : f32 to vector<2x1xf32>
      %c0_54 = arith.constant 0 : index
      %c0_55 = arith.constant 0 : index
      %96 = vector.load %arg16[%c0_54, %c0_55] : memref<2x1xf32, #tpu.memory_space<vmem>>, vector<2x1xf32>
      tpu.vector_store %arg16[%c0_54, %c0_55], %95 {strides = array<i32>} : memref<2x1xf32, #tpu.memory_space<vmem>>, vector<2x1xf32>,
      %cst_56 = arith.constant 0.000000e+00 : f32
      %97 = vector.broadcast %cst_56 : f32 to vector<2x1xf32>
      %c0_57 = arith.constant 0 : index
      %c0_58 = arith.constant 0 : index
      %98 = vector.load %arg17[%c0_57, %c0_58] : memref<2x1xf32, #tpu.memory_space<vmem>>, vector<2x1xf32>
      tpu.vector_store %arg17[%c0_57, %c0_58], %97 {strides = array<i32>} : memref<2x1xf32, #tpu.memory_space<vmem>>, vector<2x1xf32>,
    } else {
    }
    %c0 = arith.constant 0 : index
    %c0_1 = arith.constant 0 : index
    %3 = vector.load %arg15[%c0, %c0_1] : memref<2x256xbf16, #tpu.memory_space<vmem>>, vector<2x256xbf16>
    %c0_2 = arith.constant 0 : index
    %c0_3 = arith.constant 0 : index
    %4 = vector.load %arg9[%c0_2, %c0_3] : memref<256x128xbf16, #tpu.memory_space<vmem>>, vector<256x128xbf16>
    %cst = arith.constant dense<0.000000e+00> : vector<2x128xf32>
    %5 = tpu.matmul %3, %4, %cst {dimension_numbers = #tpu.dot_dimension_numbers<[1], [0], [0], [1], [0, 0, 1, 1], [], []>} : vector<2x256xbf16>, vector<256x128xbf16>, vector<2x128xf32> -> vector<2x128xf32>
    %c0_4 = arith.constant 0 : index
    %c0_5 = arith.constant 0 : index
    %6 = vector.load %arg10[%c0_4, %c0_5] : memref<1x128xf32, #tpu.memory_space<vmem>>, vector<1x128xf32>
    %7 = vector.broadcast %6 : vector<1x128xf32> to vector<2x128xf32>
    %8 = arith.addf %5, %7 : vector<2x128xf32>
    %c0_6 = arith.constant 0 : index
    %c0_7 = arith.constant 0 : index
    %9 = vector.load %arg11[%c0_6, %c0_7] : memref<2x128xf32, #tpu.memory_space<vmem>>, vector<2x128xf32>
    tpu.vector_store %arg11[%c0_6, %c0_7], %8 {strides = array<i32>} : memref<2x128xf32, #tpu.memory_space<vmem>>, vector<2x128xf32>,
    %c0_8 = arith.constant 0 : index
    %c0_9 = arith.constant 0 : index
    %10 = vector.load %arg16[%c0_8, %c0_9] : memref<2x1xf32, #tpu.memory_space<vmem>>, vector<2x1xf32>
    %cst_10 = arith.constant dense<0xFF800000> : vector<2xf32>
    %11 = vector.multi_reduction <maximumf>, %8, %cst_10 [1] : vector<2x128xf32> to vector<2xf32>
    %12 = vector.shape_cast %11 : vector<2xf32> to vector<2x1xf32>
    %13 = arith.maximumf %10, %12 : vector<2x1xf32>
    %c0_11 = arith.constant 0 : index
    %c0_12 = arith.constant 0 : index
    %14 = vector.load %arg17[%c0_11, %c0_12] : memref<2x1xf32, #tpu.memory_space<vmem>>, vector<2x1xf32>
    %15 = arith.subf %10, %13 : vector<2x1xf32>
    %16 = math.exp %15 : vector<2x1xf32>
    %17 = arith.mulf %14, %16 : vector<2x1xf32>
    %18 = vector.broadcast %13 : vector<2x1xf32> to vector<2x128xf32>
    %19 = arith.subf %8, %18 : vector<2x128xf32>
    %20 = math.exp %19 : vector<2x128xf32>
    %cst_13 = arith.constant dense<0.000000e+00> : vector<2xf32>
    %21 = vector.multi_reduction <add>, %20, %cst_13 [1] : vector<2x128xf32> to vector<2xf32>
    %22 = vector.shape_cast %21 : vector<2xf32> to vector<2x1xf32>
    %23 = arith.addf %17, %22 : vector<2x1xf32>
    %c0_14 = arith.constant 0 : index
    %c0_15 = arith.constant 0 : index
    %24 = vector.load %arg17[%c0_14, %c0_15] : memref<2x1xf32, #tpu.memory_space<vmem>>, vector<2x1xf32>
    tpu.vector_store %arg17[%c0_14, %c0_15], %23 {strides = array<i32>} : memref<2x1xf32, #tpu.memory_space<vmem>>, vector<2x1xf32>,
    %c0_16 = arith.constant 0 : index
    %c0_17 = arith.constant 0 : index
    %25 = vector.load %arg16[%c0_16, %c0_17] : memref<2x1xf32, #tpu.memory_space<vmem>>, vector<2x1xf32>
    tpu.vector_store %arg16[%c0_16, %c0_17], %13 {strides = array<i32>} : memref<2x1xf32, #tpu.memory_space<vmem>>, vector<2x1xf32>,
    %c0_i32_18 = arith.constant 0 : i32
    %26 = arith.cmpi eq, %arg0, %c0_i32_18 : i32
    %27 = arith.extui %26 : i1 to i32
    %c0_i32_19 = arith.constant 0 : i32
    %28 = arith.cmpi ne, %27, %c0_i32_19 : i32
    scf.if %28 {
      %c0_20 = arith.constant 0 : index
      %c0_21 = arith.constant 0 : index
      %29 = vector.load %arg16[%c0_20, %c0_21] : memref<2x1xf32, #tpu.memory_space<vmem>>, vector<2x1xf32>
      %c0_22 = arith.constant 0 : index
      %c0_23 = arith.constant 0 : index
      %30 = vector.load %arg17[%c0_22, %c0_23] : memref<2x1xf32, #tpu.memory_space<vmem>>, vector<2x1xf32>
      %31 = math.log %30 : vector<2x1xf32>
      %32 = arith.addf %29, %31 : vector<2x1xf32>
      %c0_24 = arith.constant 0 : index
      %c0_25 = arith.constant 0 : index
      %33 = vector.load %arg12[%c0_24, %c0_25] : memref<2x1xf32, #tpu.memory_space<vmem>>, vector<2x1xf32>
      tpu.vector_store %arg12[%c0_24, %c0_25], %32 {strides = array<i32>} : memref<2x1xf32, #tpu.memory_space<vmem>>, vector<2x1xf32>,
    } else {
    }
    return
  }
  func.func @transform_0(%arg0: i32) -> (i32, i32) {
    %c0_i32 = arith.constant 0 : i32
    %c0_i32_0 = arith.constant 0 : i32
    %c0_i32_1 = arith.constant 0 : i32
    return %c0_i32, %c0_i32_0 : i32, i32
  }
  func.func @transform_1(%arg0: i32) -> (i32, i32) {
    %c0_i32 = arith.constant 0 : i32
    %c0_i32_0 = arith.constant 0 : i32
    %c0_i32_1 = arith.constant 0 : i32
    return %c0_i32, %c0_i32_0 : i32, i32
  }
  func.func @transform_2(%arg0: i32) -> (i32, i32, i32) {
    %c0_i32 = arith.constant 0 : i32
    %c0_i32_0 = arith.constant 0 : i32
    %c0_i32_1 = arith.constant 0 : i32
    %c0_i32_2 = arith.constant 0 : i32
    return %c0_i32, %c0_i32_0, %c0_i32_1 : i32, i32, i32
  }
  func.func @transform_3(%arg0: i32) -> (i32, i32) {
    %c0_i32 = arith.constant 0 : i32
    %c0_i32_0 = arith.constant 0 : i32
    %c0_i32_1 = arith.constant 0 : i32
    return %c0_i32, %c0_i32_0 : i32, i32
  }
  func.func @transform_4(%arg0: i32) -> (i32, i32) {
    %c0_i32 = arith.constant 0 : i32
    %c0_i32_0 = arith.constant 0 : i32
    %c0_i32_1 = arith.constant 0 : i32
    return %c0_i32, %c0_i32_0 : i32, i32
  }
  func.func @transform_5(%arg0: i32) -> (i32, i32) {
    %c0_i32 = arith.constant 0 : i32
    %c0_i32_0 = arith.constant 0 : i32
    %c0_i32_1 = arith.constant 0 : i32
    return %c0_i32, %c0_i32_0 : i32, i32
  }
  func.func @transform_6(%arg0: i32) -> (i32, i32) {
    %c0_i32 = arith.constant 0 : i32
    %c0_i32_0 = arith.constant 0 : i32
    %c0_i32_1 = arith.constant 0 : i32
    return %c0_i32, %c0_i32_0 : i32, i32
  }
  func.func @transform_7(%arg0: i32) -> (i32, i32) {
    %c0_i32 = arith.constant 0 : i32
    %c0_i32_0 = arith.constant 0 : i32
    %c0_i32_1 = arith.constant 0 : i32
    return %c0_i32, %c0_i32_0 : i32, i32
  }
  func.func @transform_8(%arg0: i32) -> (i32, i32) {
    %c0_i32 = arith.constant 0 : i32
    %c0_i32_0 = arith.constant 0 : i32
    return %c0_i32, %arg0 : i32, i32
  }
  func.func @transform_9(%arg0: i32) -> (i32, i32) {
    %c0_i32 = arith.constant 0 : i32
    %c0_i32_0 = arith.constant 0 : i32
    return %c0_i32, %arg0 : i32, i32
  }
  func.func @transform_10(%arg0: i32) -> (i32, i32) {
    %c0_i32 = arith.constant 0 : i32
    %c0_i32_0 = arith.constant 0 : i32
    return %c0_i32, %arg0 : i32, i32
  }
  func.func @transform_11(%arg0: i32) -> (i32, i32) {
    %c0_i32 = arith.constant 0 : i32
    %c0_i32_0 = arith.constant 0 : i32
    %c0_i32_1 = arith.constant 0 : i32
    return %c0_i32, %c0_i32_0 : i32, i32
  }
  func.func @transform_12(%arg0: i32) -> (i32, i32) {
    %c0_i32 = arith.constant 0 : i32
    %c0_i32_0 = arith.constant 0 : i32
    %c0_i32_1 = arith.constant 0 : i32
    return %c0_i32, %c0_i32_0 : i32, i32
  }
  func.func @transform_13(%arg0: i32) -> (i32, i32) {
    %c0_i32 = arith.constant 0 : i32
    %c0_i32_0 = arith.constant 0 : i32
    %c0_i32_1 = arith.constant 0 : i32
    return %c0_i32, %c0_i32_0 : i32, i32
  }
}

</mosaic_0001>

<bundles_post_ra>
// kernel: tpu_custom_call.1
= control target key start
LH: loop header
LB: loop body
LE: loop exit
PB: predicated region body
PF: predicated region fallthrough
CT: control target
= control target key end

     0   :  { %19 = vsyncpa [#allocation6], 0  ;;  %s2677_s0 = inlined_call_operand.hbm [shape: bf16[2,128], index: 0, kind: input, shape index: {}]   ;;  %s2678_s1 = inlined_call_operand.hbm [shape: f32[2,128], index: 1, kind: input, shape index: {}]   ;;  %s2679_s2 = inlined_call_operand.hbm [shape: bf16[2,128,128], index: 2, kind: input, shape index: {}]   ;;  %s2680_s3 = inlined_call_operand.hbm [shape: f32[2,128], index: 3, kind: input, shape index: {}]   ;;  %s2681_s4 = inlined_call_operand.hbm [shape: bf16[128,384], index: 4, kind: input, shape index: {}]   ;;  %s2682_s5 = inlined_call_operand.hbm [shape: bf16[128,384], index: 5, kind: input, shape index: {}]   ;;  %s2683_s6 = inlined_call_operand.hbm [shape: f32[1,384], index: 6, kind: input, shape index: {}]   ;;  %s2684_s7 = inlined_call_operand.hbm [shape: f32[1,384], index: 7, kind: input, shape index: {}]   ;;  %s2685_s8 = inlined_call_operand.hbm [shape: bf16[256,128], index: 8, kind: input, shape index: {}]   ;;  %s2686_s9 = inlined_call_operand.hbm [shape: f32[1,128], index: 9, kind: input, shape index: {}]   ;;  %s2687_s10 = inlined_call_operand.hbm [shape: f32[2,128], index: 10, kind: output, shape index: {0}]   ;;  %s2688_s11 = inlined_call_operand.hbm [shape: f32[2,1], index: 11, kind: output, shape index: {1}]   ;;  %s2689_s12 = inlined_call_operand.hbm [shape: f32[2,128], index: 12, kind: output, shape index: {2}]   ;;  %s2690_s13 = inlined_call_operand.hbm [shape: f32[2,128], index: 13, kind: output, shape index: {3}]  }
   0x1   :  { %20 = vsyncpa [#allocation9], 0 }
   0x2   :  { %21 = vsyncpa [#allocation12], 0 }
   0x3   :  { %22 = vsyncpa [#allocation15], 0 }
   0x4   :  { %23 = vsyncpa [#allocation18], 0 }
   0x5   :  { %24 = vsyncpa [#allocation21], 0 }
   0x6   :  { %25 = vsyncpa [#allocation7], 0 }
   0x7   :  { %26 = vsyncpa [#allocation24], 0 }
   0x8   :  { %27 = vsyncpa [#allocation27], 0  ;;  %s2223_s25 = smov [#allocation8]   ;;  %s2224_s27 = smov [#allocation11]  }
   0x9   :  { %s44_s26 = sshll.u32 %s2223_s25, 4  ;;  %s66_s28 = sshll.u32 %s2224_s27, 4  ;;  %s45_s26 = int_to_ptr.vmem [resolvable:$true] %s44_s26  ;;  %s67_s28 = int_to_ptr.vmem [resolvable:$true] %s66_s28 }
   0xa   :  { %s1897_s14 = scalar_lea.hbm %s2678_s1, 32 }
   0xb   :  { %p1898_p0 = scmp.ne.s32.totalorder %s2678_s1, %s1897_s14  ;;  %p1901_p1 = scmp.lt.u32.totalorder %s1897_s14, %s2678_s1 }
   0xd   :  { %p1903_p2 = pnand %p1901_p1, %p1898_p0 }
   0xf   :  { %1906 = shalt.err (!%p1903_p2)
}
  0x10   :  { %s1907_s19 = scalar_lea.vmem %s45_s26, 32  ;;  %p1912_p4 = scmp.lt.s32.totalorder %s45_s26, %s45_s26 }
  0x11   :  { %p1908_p3 = scmp.ne.s32.totalorder %s45_s26, %s1907_s19  ;;  %p1913_p5 = scmp.lt.s32.totalorder %s1907_s19, %s1907_s19 }
  0x13   :  { %p1914_p6 = por %p1913_p5, %p1912_p4 }
  0x15   :  { %p1915_p7 = pnand %p1914_p6, %p1908_p3 }
  0x17   :  { %1918 = shalt.err (!%p1915_p7)
}
  0x18   :  { %47 = dma.hbm_to_vmem [thread:$0]  %s2678_s1, 32, %s45_s26, [#allocation9]  }
  0x19   :  { %s1919_s24 = scalar_lea.hbm %s2680_s3, 32 }
  0x1a   :  { %p1920_p8 = scmp.ne.s32.totalorder %s2680_s3, %s1919_s24  ;;  %p1923_p9 = scmp.lt.u32.totalorder %s1919_s24, %s2680_s3 }
  0x1c   :  { %p1925_p10 = pnand %p1923_p9, %p1920_p8 }
  0x1e   :  { %1928 = shalt.err (!%p1925_p10)
}
  0x1f   :  { %s1929_s14 = scalar_lea.vmem %s67_s28, 32  ;;  %p1934_p12 = scmp.lt.s32.totalorder %s67_s28, %s67_s28 }
  0x20   :  { %p1930_p11 = scmp.ne.s32.totalorder %s67_s28, %s1929_s14  ;;  %p1935_p13 = scmp.lt.s32.totalorder %s1929_s14, %s1929_s14 }
  0x22   :  { %p1936_p0 = por %p1935_p13, %p1934_p12 }
  0x24   :  { %p1937_p1 = pnand %p1936_p0, %p1930_p11 }
  0x26   :  { %1940 = shalt.err (!%p1937_p1)
}
  0x27   :  { %69 = dma.hbm_to_vmem [thread:$0]  %s2680_s3, 32, %s67_s28, [#allocation12]  }
  0x28   :  { %s2225_s15 = smov [#allocation14]   ;;  %s2226_s17 = smov [#allocation17]  }
  0x29   :  { %s87_s16 = sshll.u32 %s2225_s15, 4  ;;  %s110_s18 = sshll.u32 %s2226_s17, 4  ;;  %s88_s16 = int_to_ptr.vmem [resolvable:$true] %s87_s16  ;;  %s2341_s18 = int_to_ptr.vmem [resolvable:$true] %s110_s18 }
  0x2a   :  { %s1941_s21 = scalar_lea.hbm %s2682_s5, 3072 }
  0x2b   :  { %p1942_p2 = scmp.ne.s32.totalorder %s2682_s5, %s1941_s21  ;;  %p1945_p3 = scmp.lt.u32.totalorder %s1941_s21, %s2682_s5 }
  0x2d   :  { %p1947_p4 = pnand %p1945_p3, %p1942_p2 }
  0x2f   :  { %1950 = shalt.err (!%p1947_p4)
}
  0x30   :  { %s1951_s3 = scalar_lea.vmem %s88_s16, 3072  ;;  %p1956_p6 = scmp.lt.s32.totalorder %s88_s16, %s88_s16 }
  0x31   :  { %p1952_p5 = scmp.ne.s32.totalorder %s88_s16, %s1951_s3  ;;  %p1957_p7 = scmp.lt.s32.totalorder %s1951_s3, %s1951_s3 }
  0x33   :  { %p1958_p8 = por %p1957_p7, %p1956_p6 }
  0x35   :  { %p1959_p9 = pnand %p1958_p8, %p1952_p5 }
  0x37   :  { %1962 = shalt.err (!%p1959_p9)
}
  0x38   :  { %s2227_s28 = smov 192   ;;  %s2228_s27 = smov 12  }
  0x39   :  { %93 = dma.hbm_to_vmem [thread:$0]  %s2682_s5, 3072, %s88_s16, [#allocation15], %s2227_s28, %s2227_s28, %s2228_s27  }
  0x3a   :  { %s1963_s26 = scalar_lea.hbm %s2684_s7, 48 }
  0x3b   :  { %p1964_p10 = scmp.ne.s32.totalorder %s2684_s7, %s1963_s26  ;;  %p1967_p11 = scmp.lt.u32.totalorder %s1963_s26, %s2684_s7 }
  0x3d   :  { %p1969_p12 = pnand %p1967_p11, %p1964_p10 }
  0x3f   :  { %1972 = shalt.err (!%p1969_p12)
}
  0x40   :  { %s1973_s21 = scalar_lea.vmem %s2341_s18, 48  ;;  %s1977_s5 = scalar_lea.vmem %s2341_s18, 64 }
  0x41   :  { %p1974_p13 = scmp.ne.s32.totalorder %s2341_s18, %s1973_s21  ;;  %p1978_p0 = scmp.lt.s32.totalorder %s2341_s18, %s2341_s18 }
  0x42   :  { %p1979_p1 = scmp.lt.s32.totalorder %s1977_s5, %s1973_s21 }
  0x44   :  { %p1980_p2 = por %p1979_p1, %p1978_p0 }
  0x46   :  { %p1981_p3 = pnand %p1980_p2, %p1974_p13 }
  0x48   :  { %1984 = shalt.err (!%p1981_p3)
}
  0x49   :  { %113 = dma.hbm_to_vmem [thread:$0]  %s2684_s7, 48, %s2341_s18, [#allocation18]  }
  0x4a   :  { %s2229_s23 = smov [#allocation5]   ;;  %s2230_s25 = smov [#allocation10]  }
  0x4b   :  { %s34_s24 = sshll.u32 %s2229_s23, 4  ;;  %s53_s3 = sshll.u32 %s2230_s25, 4  ;;  %s35_s24 = int_to_ptr.vmem [resolvable:$true] %s34_s24  ;;  %s2376_s3 = int_to_ptr.vmem [resolvable:$true] %s53_s3 }
  0x4c   :  { %s1985_s14 = scalar_lea.hbm %s2677_s0, 16 }
  0x4d   :  { %p1986_p4 = scmp.ne.s32.totalorder %s2677_s0, %s1985_s14  ;;  %p1989_p5 = scmp.lt.u32.totalorder %s1985_s14, %s2677_s0 }
  0x4f   :  { %p1991_p6 = pnand %p1989_p5, %p1986_p4 }
  0x51   :  { %1994 = shalt.err (!%p1991_p6)
}
  0x52   :  { %s1995_s7 = scalar_lea.vmem %s35_s24, 16  ;;  %s1999_s18 = scalar_lea.vmem %s35_s24, 32 }
  0x53   :  { %p1996_p7 = scmp.ne.s32.totalorder %s35_s24, %s1995_s7  ;;  %p2000_p8 = scmp.lt.s32.totalorder %s35_s24, %s35_s24 }
  0x54   :  { %p2001_p9 = scmp.lt.s32.totalorder %s1999_s18, %s1995_s7 }
  0x56   :  { %p2002_p10 = por %p2001_p9, %p2000_p8 }
  0x58   :  { %p2003_p11 = pnand %p2002_p10, %p1996_p7 }
  0x5a   :  { %2006 = shalt.err (!%p2003_p11)
}
  0x5b   :  { %37 = dma.hbm_to_vmem [thread:$0]  %s2677_s0, 16, %s35_s24, [#allocation6]  }
  0x5c   :  { %s2007_s16 = scalar_lea.hbm %s2679_s2, 2048 }
  0x5d   :  { %p2008_p12 = scmp.ne.s32.totalorder %s2679_s2, %s2007_s16  ;;  %p2011_p13 = scmp.lt.u32.totalorder %s2007_s16, %s2679_s2 }
  0x5f   :  { %p2013_p0 = pnand %p2011_p13, %p2008_p12 }
  0x61   :  { %2016 = shalt.err (!%p2013_p0)
}
  0x62   :  { %s2017_s30 = scalar_lea.vmem %s2376_s3, 2048  ;;  %p2022_p2 = scmp.lt.s32.totalorder %s2376_s3, %s2376_s3 }
  0x63   :  { %p2018_p1 = scmp.ne.s32.totalorder %s2376_s3, %s2017_s30  ;;  %p2023_p3 = scmp.lt.s32.totalorder %s2017_s30, %s2017_s30 }
  0x65   :  { %p2024_p4 = por %p2023_p3, %p2022_p2 }
  0x67   :  { %p2025_p5 = pnand %p2024_p4, %p2018_p1 }
  0x69   :  { %2028 = shalt.err (!%p2025_p5)
}
  0x6a   :  { %s2231_s0 = smov 64   ;;  %s2232_s24 = smov 4  }
  0x6b   :  { %59 = dma.hbm_to_vmem [thread:$0]  %s2679_s2, 2048, %s2376_s3, [#allocation9], %s2231_s0, %s2231_s0, %s2232_s24  }
  0x6c   :  { %s2233_s26 = smov [#allocation13]   ;;  %s2234_s17 = smov [#allocation16]  }
  0x6d   :  { %s75_s15 = sshll.u32 %s2233_s26, 4  ;;  %s100_s7 = sshll.u32 %s2234_s17, 4  ;;  %s76_s15 = int_to_ptr.vmem [resolvable:$true] %s75_s15  ;;  %s101_s7 = int_to_ptr.vmem [resolvable:$true] %s100_s7 }
  0x6e   :  { %s2029_s20 = scalar_lea.hbm %s2681_s4, 3072 }
  0x6f   :  { %p2030_p6 = scmp.ne.s32.totalorder %s2681_s4, %s2029_s20  ;;  %p2033_p7 = scmp.lt.u32.totalorder %s2029_s20, %s2681_s4 }
  0x71   :  { %p2035_p8 = pnand %p2033_p7, %p2030_p6 }
  0x73   :  { %2038 = shalt.err (!%p2035_p8)
}
  0x74   :  { %s2039_s2 = scalar_lea.vmem %s76_s15, 3072  ;;  %p2044_p10 = scmp.lt.s32.totalorder %s76_s15, %s76_s15 }
  0x75   :  { %p2040_p9 = scmp.ne.s32.totalorder %s76_s15, %s2039_s2  ;;  %p2045_p11 = scmp.lt.s32.totalorder %s2039_s2, %s2039_s2 }
  0x77   :  { %p2046_p12 = por %p2045_p11, %p2044_p10 }
  0x79   :  { %p2047_p13 = pnand %p2046_p12, %p2040_p9 }
  0x7b   :  { %2050 = shalt.err (!%p2047_p13)
}
  0x7c   :  { %81 = dma.hbm_to_vmem [thread:$0]  %s2681_s4, 3072, %s76_s15, [#allocation12], %s2227_s28, %s2227_s28, %s2228_s27  }
  0x7d   :  { %s2051_s30 = scalar_lea.hbm %s2683_s6, 48 }
  0x7e   :  { %p2052_p0 = scmp.ne.s32.totalorder %s2683_s6, %s2051_s30  ;;  %p2055_p1 = scmp.lt.u32.totalorder %s2051_s30, %s2683_s6 }
  0x80   :  { %p2057_p2 = pnand %p2055_p1, %p2052_p0 }
  0x82   :  { %2060 = shalt.err (!%p2057_p2)
}
  0x83   :  { %s2061_s18 = scalar_lea.vmem %s101_s7, 48  ;;  %s2065_s19 = scalar_lea.vmem %s101_s7, 64 }
  0x84   :  { %p2062_p3 = scmp.ne.s32.totalorder %s101_s7, %s2061_s18  ;;  %p2066_p4 = scmp.lt.s32.totalorder %s101_s7, %s101_s7 }
  0x85   :  { %p2067_p5 = scmp.lt.s32.totalorder %s2065_s19, %s2061_s18 }
  0x87   :  { %p2068_p6 = por %p2067_p5, %p2066_p4 }
  0x89   :  { %p2069_p7 = pnand %p2068_p6, %p2062_p3 }
  0x8b   :  { %2072 = shalt.err (!%p2069_p7)
}
  0x8c   :  { %103 = dma.hbm_to_vmem [thread:$0]  %s2683_s6, 48, %s101_s7, [#allocation15]  }
  0x8d   :  { %s2235_s27 = smov [#allocation19]   ;;  %s2236_s20 = smov [#allocation20]  }
  0x8e   :  { %s119_s15 = sshll.u32 %s2235_s27, 4  ;;  %s132_s21 = sshll.u32 %s2236_s20, 4  ;;  %s120_s15 = int_to_ptr.vmem [resolvable:$true] %s119_s15  ;;  %s133_s21 = int_to_ptr.vmem [resolvable:$true] %s132_s21 }
  0x8f   :  { %s2073_s22 = scalar_lea.hbm %s2685_s8, 2048 }
  0x90   :  { %p2074_p8 = scmp.ne.s32.totalorder %s2685_s8, %s2073_s22  ;;  %p2077_p9 = scmp.lt.u32.totalorder %s2073_s22, %s2685_s8 }
  0x92   :  { %p2079_p10 = pnand %p2077_p9, %p2074_p8 }
  0x94   :  { %2082 = shalt.err (!%p2079_p10)
}
  0x95   :  { %s2083_s6 = scalar_lea.vmem %s120_s15, 2048  ;;  %p2088_p12 = scmp.lt.s32.totalorder %s120_s15, %s120_s15 }
  0x96   :  { %p2084_p11 = scmp.ne.s32.totalorder %s120_s15, %s2083_s6  ;;  %p2089_p13 = scmp.lt.s32.totalorder %s2083_s6, %s2083_s6 }
  0x98   :  { %p2090_p0 = por %p2089_p13, %p2088_p12 }
  0x9a   :  { %p2091_p1 = pnand %p2090_p0, %p2084_p11 }
  0x9c   :  { %2094 = shalt.err (!%p2091_p1)
}
  0x9d   :  { %125 = dma.hbm_to_vmem [thread:$0]  %s2685_s8, 2048, %s120_s15, [#allocation18], %s2231_s0, %s2231_s0, %s2232_s24  }
  0x9e   :  { %s2095_s1 = scalar_lea.hbm %s2686_s9, 16 }
  0x9f   :  { %p2096_p2 = scmp.ne.s32.totalorder %s2686_s9, %s2095_s1  ;;  %p2099_p3 = scmp.lt.u32.totalorder %s2095_s1, %s2686_s9 }
  0xa1   :  { %p2101_p4 = pnand %p2099_p3, %p2096_p2 }
  0xa3   :  { %2104 = shalt.err (!%p2101_p4)
}
  0xa4   :  { %s2105_s4 = scalar_lea.vmem %s133_s21, 16  ;;  %s2109_s28 = scalar_lea.vmem %s133_s21, 32 }
  0xa5   :  { %p2106_p5 = scmp.ne.s32.totalorder %s133_s21, %s2105_s4  ;;  %p2110_p6 = scmp.lt.s32.totalorder %s133_s21, %s133_s21 }
  0xa6   :  { %p2111_p7 = scmp.lt.s32.totalorder %s2109_s28, %s2105_s4 }
  0xa8   :  { %p2112_p8 = por %p2111_p7, %p2110_p6 }
  0xaa   :  { %p2113_p9 = pnand %p2112_p8, %p2106_p5 }
  0xac   :  { %2116 = shalt.err (!%p2113_p9)
}
  0xad   :  { %135 = dma.hbm_to_vmem [thread:$0]  %s2686_s9, 16, %s133_s21, [#allocation21]  }
  0xae   :  { %2205 = dma.done.wait [#allocation6], 16  }
  0xaf   :  { %2206 = vsyncadd [#allocation6], 4294967280 }
  0xb0   :  { %2207 = dma.done.wait [#allocation9], 2080  }
  0xb1   :  { %2208 = vsyncadd [#allocation9], 4294965216 }
  0xb2   :  { %2209 = dma.done.wait [#allocation12], 3104  }
  0xb3   :  { %2210 = vsyncadd [#allocation12], 4294964192 }
  0xb4   :  { %2211 = dma.done.wait [#allocation15], 3120  }
  0xb5   :  { %2212 = vsyncadd [#allocation15], 4294964176 }
  0xb6   :  { %2213 = dma.done.wait [#allocation18], 2096  }
  0xb7   :  { %2214 = vsyncadd [#allocation18], 4294965200 }
  0xb8   :  { %2215 = dma.done.wait [#allocation21], 16  }
  0xb9   :  { %2216 = vsyncadd [#allocation21], 4294967280  ;;  %v2237_v0 = vmov 0.0   ;;  %v2238_v1 = vmov 0   ;;  %vm2239_vm0 = vmmov 0   ;;  %v2498_v53 = vld [vmem:[#allocation10] sm:$0xff]  }
  0xba   :  { %1625 = vmatprep.subr.bf16.mxu1 %v2237_v0  ;;  %382 = vmatprep.mubr.bf16.mxu0 %v2238_v1  ;;  %v1779_v2 = vld [vmem:[#allocation13 + $0x4] ss:$12 sps:$4 sm:$0xff]   ;;  %v1781_v3 = vld [vmem:[#allocation13] ss:$12 sps:$4 sm:$0xff]   ;;  %v1782_v4 = vld [vmem:[#allocation13 + $0x1c] ss:$12 sps:$4 sm:$0xff]  }
  0xbb   :  { %1641 = vmatprep.mubr.msk.bf16.mxu1 %vm2239_vm0, %v2237_v0  ;;  %1777 = vset.pattern.permute.xlu1 %v2238_v1  ;;  %v1784_v5 = vld [vmem:[#allocation13 + $0x18] ss:$12 sps:$4 sm:$0xff]   ;;  %v1785_v6 = vld [vmem:[#allocation13 + $0x34] ss:$12 sps:$4 sm:$0xff]   ;;  %v1787_v7 = vld [vmem:[#allocation13 + $0x30] ss:$12 sps:$4 sm:$0xff]  }
  0xbc   :  { %1778 = vset.pattern.permute.xlu0 %v2238_v1  ;;  %350 = vmatprep.subr.bf16.mxu0 %v1779_v2  ;;  %v1788_v8 = vld [vmem:[#allocation13 + $0x4c] ss:$12 sps:$4 sm:$0xff]   ;;  %v1799_v9 = vld [vmem:[#allocation13 + $0x8] ss:$12 sps:$4 sm:$0xff]   ;;  %v1791_v11 = vld [vmem:[#allocation13 + $0x64] ss:$12 sps:$4 sm:$0xff]  }
  0xbd   :  { %351 = vmatpush1.bf16.msra.mxu0 %v1781_v3  ;;  %v1790_v10 = vld [vmem:[#allocation13 + $0x48] ss:$12 sps:$4 sm:$0xff]   ;;  %1626 = vmatpush3.bf16.msra.mxu1 %v1799_v9  ;;  %v1803_v12 = vld [vmem:[#allocation13 + $0x20] ss:$12 sps:$4 sm:$0xff]   ;;  %v1805_v14 = vld [vmem:[#allocation13 + $0x38] ss:$12 sps:$4 sm:$0xff]  }
  0xbe   :  { %352 = vmatprep.subr.bf16.mxu0 %v1782_v4  ;;  %1627 = vmatprep.subr.bf16.mxu1 %v2237_v0  ;;  %v1793_v13 = vld [vmem:[#allocation13 + $0x60] ss:$12 sps:$4 sm:$0xff]   ;;  %v1794_v15 = vld [vmem:[#allocation13 + $0x7c] ss:$12 sps:$4 sm:$0xff]   ;;  %v1796_v16 = vld [vmem:[#allocation13 + $0x78] ss:$12 sps:$4 sm:$0xff]  }
  0xbf   :  { %v1809_v17 = vld [vmem:[#allocation13 + $0x50] ss:$12 sps:$4 sm:$0xff]   ;;  %v1797_v18 = vld [vmem:[#allocation13 + $0x94] ss:$12 sps:$4 sm:$0xff]   ;;  %v1801_v21 = vld [vmem:[#allocation13 + $0xac] ss:$12 sps:$4 sm:$0xff]  }
  0xc0   :  { %v1800_v19 = vld [vmem:[#allocation13 + $0x90] ss:$12 sps:$4 sm:$0xff]   ;;  %v1813_v20 = vld [vmem:[#allocation13 + $0x68] ss:$12 sps:$4 sm:$0xff]   ;;  %v1817_v23 = vld [vmem:[#allocation13 + $0x80] ss:$12 sps:$4 sm:$0xff]  }
  0xc1   :  { %353 = vmatpush1.bf16.msra.mxu0 %v1784_v5  ;;  %1628 = vmatpush3.bf16.msra.mxu1 %v1803_v12  ;;  %v1804_v22 = vld [vmem:[#allocation13 + $0xa8] ss:$12 sps:$4 sm:$0xff]   ;;  %v1808_v24 = vld [vmem:[#allocation14 + $0x4] ss:$12 sps:$4 sm:$0xff]   ;;  %v1806_v25 = vld [vmem:[#allocation14] ss:$12 sps:$4 sm:$0xff]  }
  0xc2   :  { %354 = vmatprep.subr.bf16.mxu0 %v1785_v6  ;;  %1629 = vmatprep.subr.bf16.mxu1 %v2237_v0  ;;  %v171_v26 = vld [vmem:[#allocation5] sm:$0x1]  ;;  %v1812_v28 = vld [vmem:[#allocation14 + $0x1c] ss:$12 sps:$4 sm:$0xff]   ;;  %v1816_v31 = vld [vmem:[#allocation14 + $0x34] ss:$12 sps:$4 sm:$0xff]  }
  0xc3   :  { %v1821_v27 = vld [vmem:[#allocation13 + $0x98] ss:$12 sps:$4 sm:$0xff]   ;;  %v1825_v30 = vld [vmem:[#allocation13 + $0xb0] ss:$12 sps:$4 sm:$0xff]   ;;  %v1832_v34 = vld [vmem:[#allocation14 + $0x8] ss:$12 sps:$4 sm:$0xff]  }
  0xc4   :  { %v1810_v29 = vld [vmem:[#allocation14 + $0x18] ss:$12 sps:$4 sm:$0xff]   ;;  %v1814_v32 = vld [vmem:[#allocation14 + $0x30] ss:$12 sps:$4 sm:$0xff]   ;;  %v1818_v35 = vld [vmem:[#allocation14 + $0x48] ss:$12 sps:$4 sm:$0xff]  }
  0xc5   :  { %355 = vmatpush1.bf16.msra.mxu0 %v1787_v7  ;;  %1630 = vmatpush3.bf16.msra.mxu1 %v1805_v14  ;;  %v1820_v33 = vld [vmem:[#allocation14 + $0x4c] ss:$12 sps:$4 sm:$0xff]   ;;  %v1824_v37 = vld [vmem:[#allocation14 + $0x64] ss:$12 sps:$4 sm:$0xff]   ;;  %v1828_v40 = vld [vmem:[#allocation14 + $0x7c] ss:$12 sps:$4 sm:$0xff]  }
  0xc6   :  { %356 = vmatprep.subr.bf16.mxu0 %v1788_v8  ;;  %1631 = vmatprep.subr.bf16.mxu1 %v2237_v0  ;;  %v1836_v36 = vld [vmem:[#allocation14 + $0x20] ss:$12 sps:$4 sm:$0xff]   ;;  %v1837_v39 = vld [vmem:[#allocation14 + $0x38] ss:$12 sps:$4 sm:$0xff]   ;;  %v1838_v42 = vld [vmem:[#allocation14 + $0x50] ss:$12 sps:$4 sm:$0xff]  }
  0xc7   :  { %v1822_v38 = vld [vmem:[#allocation14 + $0x60] ss:$12 sps:$4 sm:$0xff]   ;;  %v1826_v41 = vld [vmem:[#allocation14 + $0x78] ss:$12 sps:$4 sm:$0xff]   ;;  %v1829_v44 = vld [vmem:[#allocation14 + $0x90] ss:$12 sps:$4 sm:$0xff]  }
  0xc8   :  { %v1831_v43 = vld [vmem:[#allocation14 + $0x94] ss:$12 sps:$4 sm:$0xff]   ;;  %v1835_v46 = vld [vmem:[#allocation14 + $0xac] ss:$12 sps:$4 sm:$0xff]   ;;  %v2485_v48 = vld [vmem:[#allocation8] sm:$0x3] }
  0xc9   :  { %357 = vmatpush1.bf16.msra.mxu0 %v1790_v10  ;;  %1632 = vmatpush3.bf16.msra.mxu1 %v1809_v17  ;;  %v1839_v45 = vld [vmem:[#allocation14 + $0x68] ss:$12 sps:$4 sm:$0xff]   ;;  %v1840_v49 = vld [vmem:[#allocation14 + $0x80] ss:$12 sps:$4 sm:$0xff]   ;;  %v431_v50 = vpack.c.bf16 %v2485_v48, %v2485_v48  ;;  %v1841_v51 = vld [vmem:[#allocation14 + $0x98] ss:$12 sps:$4 sm:$0xff]   ;;  %v207_v10 = vlaneseq }
  0xca   :  { %358 = vmatprep.subr.bf16.mxu0 %v1791_v11  ;;  %1633 = vmatprep.subr.bf16.mxu1 %v2237_v0  ;;  %v1833_v47 = vld [vmem:[#allocation14 + $0xa8] ss:$12 sps:$4 sm:$0xff]   ;;  %v1842_v52 = vld [vmem:[#allocation14 + $0xb0] ss:$12 sps:$4 sm:$0xff]   ;;  %v205_v14 = vld [vmem:[#allocation16] sm:$0x7] }
  0xcb   :  { %v2500_v54 = vld [vmem:[#allocation10 + $0x40] sm:$0xff]   ;;  %v2506_v55 = vld [vmem:[#allocation10 + $0x8] sm:$0xff]   ;;  %v2514_v57 = vld [vmem:[#allocation10 + $0x10] sm:$0xff]   ;;  %v2562_v11 = vshrl.u32 %v207_v10, 7  ;;  %vm959_vm1 = vcmask 1041409   ;;  %vm962_vm2 = vcmask 1041408  }
  0xcc   :  { %v2509_v56 = vld [vmem:[#allocation10 + $0x48] sm:$0xff]   ;;  %v2517_v58 = vld [vmem:[#allocation10 + $0x50] sm:$0xff]   ;;  %v2522_v59 = vld [vmem:[#allocation10 + $0x18] sm:$0xff]   ;;  %vm1162_vm3 = vcmask 1024   ;;  %s2243_s9 = smov [#allocation22]  }
  0xcd   :  { %359 = vmatpush1.bf16.msra.mxu0 %v1793_v13  ;;  %1634 = vmatpush3.bf16.msra.mxu1 %v1813_v20  ;;  %v2525_v60 = vld [vmem:[#allocation10 + $0x58] sm:$0xff]   ;;  %v2530_v61 = vld [vmem:[#allocation10 + $0x20] sm:$0xff]   ;;  %v2538_v63 = vld [vmem:[#allocation10 + $0x28] sm:$0xff]   ;;  %v209_v12 = vsub.s32 0, %v2562_v11  ;;  %1164 = vst.msk [vmem:[#allocation4] sm:$0x3] %vm1162_vm3, %v2237_v0 }
  0xce   :  { %360 = vmatprep.subr.bf16.mxu0 %v1794_v15  ;;  %1635 = vmatprep.subr.bf16.mxu1 %v2237_v0  ;;  %v2533_v62 = vld [vmem:[#allocation10 + $0x60] sm:$0xff]   ;;  %v2546_v2 = vld [vmem:[#allocation10 + $0x30] sm:$0xff]   ;;  %v2554_v4 = vld [vmem:[#allocation10 + $0x38] sm:$0xff]   ;;  %v213_v15 = vsub.s32 1, %v2562_v11  ;;  %s1408_s24 = sshll.u32 %s2243_s9, 4  ;;  %s1409_s24 = int_to_ptr.vmem [resolvable:$true] %s1408_s24 }
  0xcf   :  { %v2549_v3 = vld [vmem:[#allocation10 + $0x70] sm:$0xff]   ;;  %v2556_v5 = vld [vmem:[#allocation10 + $0x78] sm:$0xff]   ;;  %v464_v13 = vld [vmem:[#allocation17] sm:$0x7]  ;;  %s2117_s27 = scalar_lea.vmem %s1409_s24, 32  ;;  %p2122_p11 = scmp.lt.s32.totalorder %s1409_s24, %s1409_s24 }
  0xd0   :  { %v469_v17 = vrot.slane %v464_v13, %v209_v12  ;;  %p2118_p10 = scmp.ne.s32.totalorder %s1409_s24, %s2117_s27  ;;  %p2123_p12 = scmp.lt.s32.totalorder %s2117_s27, %s2117_s27 }
  0xd1   :  { %361 = vmatpush1.bf16.msra.mxu0 %v1796_v16  ;;  %1636 = vmatpush3.bf16.msra.mxu1 %v1817_v23  ;;  %v210_v16 = vrot.slane %v205_v14, %v209_v12 }
  0xd2   :  { %362 = vmatprep.subr.bf16.mxu0 %v1797_v18  ;;  %1637 = vmatprep.subr.bf16.mxu1 %v2237_v0  ;;  %v214_v18 = vrot.slane %v205_v14, %v213_v15  ;;  %p2124_p13 = por %p2123_p12, %p2122_p11 }
  0xd3   :  { %v1745_v20 = vadd.f32 %v469_v17, %v210_v16 }
  0xd4   :  { %p2125_p0 = pnand %p2124_p13, %p2118_p10 }
  0xd5   :  { %363 = vmatpush1.bf16.msra.mxu0 %v1800_v19  ;;  %1638 = vmatpush3.bf16.msra.mxu1 %v1821_v27  ;;  %v473_v19 = vrot.slane %v464_v13, %v213_v15 }
  0xd6   :  { %364 = vmatprep.subr.bf16.mxu0 %v1801_v21  ;;  %1639 = vmatprep.subr.bf16.mxu1 %v2237_v0 }
  0xd9   :  { %365 = vmatpush1.bf16.msra.mxu0 %v1804_v22  ;;  %1640 = vmatpush3.bf16.msra.mxu1 %v1825_v30  ;;  %v1747_v22 = vadd.f32 %v473_v19, %v214_v18 }
  0xda   :  { %609 = vmatprep.subr.bf16.mxu0 %v1808_v24  ;;  %1645 = vmatprep.subr.bf16.mxu1 %v2237_v0 }
  0xdc   :  { %383 = vmatmul.mubr.bf16.vlgmr.msra.gmra.mrb[0].mxu0 %v171_v26  ;;  %1642 = vmatmul.mubr.bf16.vlgmr.msra.gmra.mrb[0].mxu1 %v171_v26 }
  0xdd   :  { %610 = vmatpush1.bf16.msra.mxu0 %v1806_v25  ;;  %641 = vmatprep.mubr.bf16.mxu0 %v2238_v1  ;;  %v2541_v1 = vld [vmem:[#allocation10 + $0x68] sm:$0xff]  }
  0xde   :  { %611 = vmatprep.subr.bf16.mxu0 %v1812_v28  ;;  %1646 = vmatpush3.bf16.msra.mxu1 %v1832_v34 }
  0xdf   :  { %1647 = vmatprep.subr.bf16.mxu1 %v2237_v0  ;;  %1661 = vmatprep.mubr.msk.bf16.mxu1 %vm2239_vm0, %v2237_v0 }
  0xe1   :  { %612 = vmatpush1.bf16.msra.mxu0 %v1810_v29 }
  0xe2   :  { %613 = vmatprep.subr.bf16.mxu0 %v1816_v31  ;;  %1648 = vmatpush3.bf16.msra.mxu1 %v1836_v36  ;;  %v217_v36 = vsub.s32 2, %v2562_v11 }
  0xe3   :  { %1649 = vmatprep.subr.bf16.mxu1 %v2237_v0 }
  0xe5   :  { %614 = vmatpush1.bf16.msra.mxu0 %v1814_v32 }
  0xe6   :  { %615 = vmatprep.subr.bf16.mxu0 %v1820_v33  ;;  %1650 = vmatpush3.bf16.msra.mxu1 %v1837_v39  ;;  %v218_v39 = vrot.slane %v205_v14, %v217_v36 }
  0xe7   :  { %1651 = vmatprep.subr.bf16.mxu1 %v2237_v0 }
  0xe9   :  { %616 = vmatpush1.bf16.msra.mxu0 %v1818_v35 }
  0xea   :  { %617 = vmatprep.subr.bf16.mxu0 %v1824_v37  ;;  %1652 = vmatpush3.bf16.msra.mxu1 %v1838_v42  ;;  %v477_v37 = vrot.slane %v464_v13, %v217_v36 }
  0xeb   :  { %1653 = vmatprep.subr.bf16.mxu1 %v2237_v0 }
  0xed   :  { %618 = vmatpush1.bf16.msra.mxu0 %v1822_v38 }
  0xee   :  { %619 = vmatprep.subr.bf16.mxu0 %v1828_v40  ;;  %1654 = vmatpush3.bf16.msra.mxu1 %v1839_v45 }
  0xef   :  { %1655 = vmatprep.subr.bf16.mxu1 %v2237_v0 }
  0xf1   :  { %620 = vmatpush1.bf16.msra.mxu0 %v1826_v41 }
  0xf2   :  { %621 = vmatprep.subr.bf16.mxu0 %v1831_v43  ;;  %1656 = vmatpush3.bf16.msra.mxu1 %v1840_v49 }
  0xf3   :  { %1657 = vmatprep.subr.bf16.mxu1 %v2237_v0 }
  0xf5   :  { %622 = vmatpush1.bf16.msra.mxu0 %v1829_v44 }
  0xf6   :  { %623 = vmatprep.subr.bf16.mxu0 %v1835_v46  ;;  %1658 = vmatpush3.bf16.msra.mxu1 %v1841_v51  ;;  %v2240_v46 = vmov 1966171168  }
  0xf7   :  { %1659 = vmatprep.subr.bf16.mxu1 %v2237_v0 }
  0xf9   :  { %624 = vmatpush1.bf16.msra.mxu0 %v1833_v47  ;;  %v746_v47 = vunpack.c.l.s4 %v2240_v46  ;;  %v1868_v46 = vld [vmem:[#allocation19 + $0x20] sm:$0xff]  }
  0xfa   :  { %1665 = vmatprep.subr.bf16.mxu0 %v2237_v0  ;;  %1660 = vmatpush3.bf16.msra.mxu1 %v1842_v52 }
  0xfb   :  { %1685 = vmatprep.subr.bf16.mxu1 %v2237_v0 }
  0xfc   :  { %642 = vmatmul.mubr.bf16.vlgmr.msra.gmra.mrb[0].mxu0 %v431_v50 }
  0xfd   :  { %1681 = vmatprep.mubr.msk.bf16.mxu0 %vm2239_vm0, %v2237_v0  ;;  %1662 = vmatmul.mubr.bf16.vlgmr.msra.gmra.mrb[4].mxu1 %v431_v50  ;;  %v747_v50 = vunpack.c.0.s8 %v746_v47  ;;  %v1869_v47 = vld [vmem:[#allocation19 + $0x68] sm:$0xff]  }
  0xfe   :  { %1701 = vmatprep.mubr.msk.bf16.mxu1 %vm2239_vm0, %v2237_v0 }
 0x102   :  { %1666 = vmatpush3.bf16.xpose.msra.mxu0 %v2498_v53 }
 0x103   :  { %1686 = vmatpush3.bf16.xpose.msra.mxu1 %v2500_v54  ;;  %1667 = vmatprep.subr.bf16.mxu0 %v2237_v0 }
 0x104   :  { %1687 = vmatprep.subr.bf16.mxu1 %v2237_v0 }
 0x10a   :  { %1668 = vmatpush3.bf16.xpose.msra.mxu0 %v2506_v55 }
 0x10b   :  { %1669 = vmatprep.subr.bf16.mxu0 %v2237_v0  ;;  %1688 = vmatpush3.bf16.xpose.msra.mxu1 %v2509_v56 }
 0x10c   :  { %1689 = vmatprep.subr.bf16.mxu1 %v2237_v0 }
 0x112   :  { %1670 = vmatpush3.bf16.xpose.msra.mxu0 %v2514_v57 }
 0x113   :  { %1671 = vmatprep.subr.bf16.mxu0 %v2237_v0  ;;  %1690 = vmatpush3.bf16.xpose.msra.mxu1 %v2517_v58 }
 0x114   :  { %1691 = vmatprep.subr.bf16.mxu1 %v2237_v0 }
 0x11a   :  { %1672 = vmatpush3.bf16.xpose.msra.mxu0 %v2522_v59 }
 0x11b   :  { %1673 = vmatprep.subr.bf16.mxu0 %v2237_v0  ;;  %1692 = vmatpush3.bf16.xpose.msra.mxu1 %v2525_v60 }
 0x11c   :  { %1693 = vmatprep.subr.bf16.mxu1 %v2237_v0 }
 0x122   :  { %1674 = vmatpush3.bf16.xpose.msra.mxu0 %v2530_v61 }
 0x123   :  { %1675 = vmatprep.subr.bf16.mxu0 %v2237_v0  ;;  %1694 = vmatpush3.bf16.xpose.msra.mxu1 %v2533_v62 }
 0x124   :  { %1695 = vmatprep.subr.bf16.mxu1 %v2237_v0 }
 0x12a   :  { %1676 = vmatpush3.bf16.xpose.msra.mxu0 %v2538_v63 }
 0x12b   :  { %1677 = vmatprep.subr.bf16.mxu0 %v2237_v0  ;;  %1696 = vmatpush3.bf16.xpose.msra.mxu1 %v2541_v1 }
 0x12c   :  { %1697 = vmatprep.subr.bf16.mxu1 %v2237_v0 }
 0x132   :  { %1678 = vmatpush3.bf16.xpose.msra.mxu0 %v2546_v2 }
 0x133   :  { %1679 = vmatprep.subr.bf16.mxu0 %v2237_v0  ;;  %1698 = vmatpush3.bf16.xpose.msra.mxu1 %v2549_v3 }
 0x134   :  { %1699 = vmatprep.subr.bf16.mxu1 %v2237_v0 }
 0x13a   :  { %1680 = vmatpush3.bf16.xpose.msra.mxu0 %v2554_v4 }
 0x13b   :  { %1705 = vmatprep.subr.bf16.mxu0 %v2237_v0  ;;  %1700 = vmatpush3.bf16.xpose.msra.mxu1 %v2556_v5 }
 0x13c   :  { %1725 = vmatprep.subr.bf16.mxu1 %v2237_v0 }
 0x1af   :  { %v425_v6 = vpop.f32.mrb[0].mxu1 }
 0x1b0   :  { %v1643_v7 = vpop.f32.mrb[1].mxu1  ;;  %v426_v43 = vadd.f32 %v425_v6, %v218_v39  ;;  %v1861_v39 = vld [vmem:[#allocation19 + $0x48] sm:$0xff]  }
 0x1b1   :  { %v428_v8 = vpop.f32.mrb[2].mxu1 }
 0x1b2   :  { %v1644_v9 = vpop.f32.mrb[3].mxu1 }
 0x1b3   :  { %v2569_v9 = vsub.s32 %v747_v50, %v2562_v11  ;;  %v1871_v50 = vld [vmem:[#allocation19 + $0x70] sm:$0xff]  }
 0x1cf   :  { %v643_v21 = vpop.f32.mrb[0].mxu0 }
 0x1d0   :  { %v1746_v23 = vadd.f32 %v1745_v20, %v643_v21  ;;  %v645_v24 = vpop.f32.mrb[1].mxu0  ;;  %v684_v30 = vpop.f32.mrb[4].mxu1 }
 0x1d1   :  { %v647_v25 = vpop.f32.mrb[2].mxu0  ;;  %v1748_v28 = vadd.f32 %v1747_v22, %v645_v24  ;;  %v1663_v31 = vpop.f32.mrb[5].mxu1  ;;  %v685_v41 = vadd.f32 %v684_v30, %v477_v37  ;;  %v1859_v37 = vld [vmem:[#allocation19 + $0x40] sm:$0xff]  }
 0x1d2   :  { %v1511_v26 = vmul.f32 -1.442695, %v1746_v23  ;;  %v648_v27 = vpop.f32.mrb[3].mxu0  ;;  %v687_v32 = vpop.f32.mrb[6].mxu1 }
 0x1d3   :  { %v1512_v29 = vmul.f32 -1.442695, %v1748_v28  ;;  %v1664_v33 = vpop.f32.mrb[7].mxu1 }
 0x1d4   :  { %1875 = vpow2.f32 %v1511_v26 }
 0x1d5   :  { %1877 = vpow2.f32 %v1512_v29 }
 0x1de   :  { %v1876_v34 = vpop.eup %1875 }
 0x1df   :  { %v694_v35 = vadd.f32 1.0, %v1876_v34  ;;  %v1878_v38 = vpop.eup %1877 }
 0x1e0   :  { %v701_v40 = vadd.f32 1.0, %v1878_v38  ;;  %v1860_v38 = vld [vmem:[#allocation19] sm:$0xff]  }
 0x1e1   :  { %1879 = vrcp.f32 %v694_v35 }
 0x1e2   :  { %1881 = vrcp.f32 %v701_v40  ;;  %v1862_v40 = vld [vmem:[#allocation19 + $0x8] sm:$0xff]  }
 0x1eb   :  { %v1880_v42 = vpop.eup %1879 }
 0x1ec   :  { %v704_v44 = vmul.f32 %v1880_v42, %v685_v41  ;;  %v1882_v49 = vpop.eup %1881  ;;  %v1863_v41 = vld [vmem:[#allocation19 + $0x50] sm:$0xff]  }
 0x1ed   :  { %v707_v51 = vsub.f32 1.0, %v1882_v49  ;;  %v709_v7 = vmul.f32 %v1882_v49, %v2485_v48  ;;  %v949_v48 = vld [vmem:[#allocation11] sm:$0x3]  ;;  %v1870_v49 = vld [vmem:[#allocation19 + $0x28] sm:$0xff]  }
 0x1ee   :  { %v705_v45 = vadd.f32 %v704_v44, %v426_v43  ;;  %v1864_v42 = vld [vmem:[#allocation19 + $0x10] sm:$0xff]   ;;  %v1865_v43 = vld [vmem:[#allocation19 + $0x58] sm:$0xff]  }
 0x1ef   :  { %v1866_v44 = vld [vmem:[#allocation19 + $0x18] sm:$0xff]  }
 0x1f0   :  { %1883 = vtanh.f32 %v705_v45  ;;  %v1867_v45 = vld [vmem:[#allocation19 + $0x60] sm:$0xff]  }
 0x1fa   :  { %v1884_v52 = vpop.eup %1883 }
 0x1fb   :  { %v708_v8 = vmul.f32 %v1884_v52, %v707_v51  ;;  %v1872_v51 = vld [vmem:[#allocation19 + $0x30] sm:$0xff]   ;;  %v1873_v52 = vld [vmem:[#allocation19 + $0x78] sm:$0xff]  }
 0x1fd   :  { %v710_v10 = vadd.f32 %v709_v7, %v708_v8  ;;  %v1874_v7 = vld [vmem:[#allocation19 + $0x38] sm:$0xff]   ;;  %v2241_v8 = vmov 1935823168  }
 0x1ff   :  { %v743_v13 = vpack.c.bf16 %v710_v10, %v710_v10  ;;  %1073 = vst [vmem:[#allocation25] sm:$0x3] %v710_v10  ;;  %v1114_v10 = vunpack.c.l.s4 %v2241_v8 }
 0x201   :  { %v751_v6 = vrot.slane %v743_v13, %v2569_v9  ;;  %1080 = vst [vmem:[#allocation2] sm:$0x1] %v743_v13  ;;  %v1115_v13 = vunpack.c.0.s8 %v1114_v10 }
 0x203   :  { %v758_v14 = vrot.slane %v751_v6, %v2569_v9 }
 0x205   :  { %v1513_v15 = vpack.i.b16 %v758_v14, %v758_v14  ;;  %v760_v16 = vunpack.i.h.s16 %v758_v14 }
 0x207   :  { %v765_v17 = vrot.slane %v1513_v15, %v209_v12  ;;  %v855_v18 = vpack.i.b16 %v760_v16, %v760_v16 }
 0x209   :  { %1682 = vmatmul.mubr.bf16.vlgmr.msra.gmra.mrb[4].mxu0 %v765_v17  ;;  %v859_v19 = vrot.slane %v855_v18, %v209_v12 }
 0x20a   :  { %1706 = vmatpush3.bf16.msra.mxu0 %v2498_v53  ;;  %1721 = vmatprep.mubr.msk.bf16.mxu0 %vm2239_vm0, %v2237_v0  ;;  %v951_v53 = vrot.slane %v949_v48, 1 }
 0x20b   :  { %1702 = vmatmul.mubr.bf16.vlgmr.msra.gmra.mrb[8].mxu1 %v859_v19  ;;  %1707 = vmatprep.subr.bf16.mxu0 %v2237_v0  ;;  %v1118_v19 = vsub.s32 %v1115_v13, %v2562_v11 }
 0x20c   :  { %1726 = vmatpush3.bf16.msra.mxu1 %v2500_v54  ;;  %1741 = vmatprep.mubr.msk.bf16.mxu1 %vm2239_vm0, %v2237_v0 }
 0x20d   :  { %1727 = vmatprep.subr.bf16.mxu1 %v2237_v0 }
 0x20e   :  { %1708 = vmatpush3.bf16.msra.mxu0 %v2506_v55 }
 0x20f   :  { %1709 = vmatprep.subr.bf16.mxu0 %v2237_v0 }
 0x210   :  { %1728 = vmatpush3.bf16.msra.mxu1 %v2509_v56 }
 0x211   :  { %1729 = vmatprep.subr.bf16.mxu1 %v2237_v0 }
 0x212   :  { %1710 = vmatpush3.bf16.msra.mxu0 %v2514_v57 }
 0x213   :  { %1711 = vmatprep.subr.bf16.mxu0 %v2237_v0 }
 0x214   :  { %1730 = vmatpush3.bf16.msra.mxu1 %v2517_v58 }
 0x215   :  { %1731 = vmatprep.subr.bf16.mxu1 %v2237_v0 }
 0x216   :  { %1712 = vmatpush3.bf16.msra.mxu0 %v2522_v59 }
 0x217   :  { %1713 = vmatprep.subr.bf16.mxu0 %v2237_v0 }
 0x218   :  { %1732 = vmatpush3.bf16.msra.mxu1 %v2525_v60 }
 0x219   :  { %1733 = vmatprep.subr.bf16.mxu1 %v2237_v0 }
 0x21a   :  { %1714 = vmatpush3.bf16.msra.mxu0 %v2530_v61 }
 0x21b   :  { %1715 = vmatprep.subr.bf16.mxu0 %v2237_v0 }
 0x21c   :  { %1734 = vmatpush3.bf16.msra.mxu1 %v2533_v62 }
 0x21d   :  { %1735 = vmatprep.subr.bf16.mxu1 %v2237_v0 }
 0x21e   :  { %1716 = vmatpush3.bf16.msra.mxu0 %v2538_v63 }
 0x21f   :  { %1717 = vmatprep.subr.bf16.mxu0 %v2237_v0 }
 0x220   :  { %1736 = vmatpush3.bf16.msra.mxu1 %v2541_v1 }
 0x221   :  { %1737 = vmatprep.subr.bf16.mxu1 %v2237_v0 }
 0x222   :  { %1718 = vmatpush3.bf16.msra.mxu0 %v2546_v2 }
 0x223   :  { %1719 = vmatprep.subr.bf16.mxu0 %v2237_v0 }
 0x224   :  { %1738 = vmatpush3.bf16.msra.mxu1 %v2549_v3 }
 0x225   :  { %1739 = vmatprep.subr.bf16.mxu1 %v2237_v0 }
 0x226   :  { %1720 = vmatpush3.bf16.msra.mxu0 %v2554_v4 }
 0x227   :  { %1603 = vmatprep.subr.bf16.mxu0 %v1859_v37 }
 0x228   :  { %1740 = vmatpush3.bf16.msra.mxu1 %v2556_v5 }
 0x2dc   :  { %v849_v54 = vpop.f32.mrb[4].mxu0 }
 0x2dd   :  { %v1683_v55 = vpop.f32.mrb[5].mxu0  ;;  %v954_v62 = vadd.f32 %v949_v48, %v849_v54 }
 0x2de   :  { %v852_v56 = vpop.f32.mrb[6].mxu0  ;;  %v943_v57 = vpop.f32.mrb[8].mxu1 }
 0x2df   :  { %v955_v58 = vadd.f32 %v951_v53, %v943_v57  ;;  %v1684_v59 = vpop.f32.mrb[7].mxu0  ;;  %v1703_v60 = vpop.f32.mrb[9].mxu1 }
 0x2e0   :  { %v946_v61 = vpop.f32.mrb[10].mxu1 }
 0x2e1   :  { %v958_v63 = vrot.slane %v955_v58, 7  ;;  %v1704_v1 = vpop.f32.mrb[11].mxu1 }
 0x2e3   :  { %v960_v2 = vsel %vm959_vm1, %v958_v63, %v954_v62 }
 0x2e4   :  { %v963_v3 = vsel %vm962_vm2, %v960_v2, -inf }
 0x2e5   :  { %964 = vmax.xlane.f32.xlu0 %v963_v3 }
 0x372   :  { %v965_v4 = vpop.xlane.xlu0 %964 }
 0x373   :  { %v967_v5 = vrot.slane %v965_v4, 1  ;;  %v970_v12 = vsub.f32 %v954_v62, %v965_v4 }
 0x375   :  { %v971_v20 = vsub.f32 %v955_v58, %v967_v5  ;;  %v972_v21 = vmul.f32 1.442695, %v970_v12 }
 0x377   :  { %v974_v22 = vmul.f32 1.442695, %v971_v20 }
 0x379   :  { %1885 = vpow2.f32 %v974_v22 }
 0x37a   :  { %1887 = vpow2.f32 %v972_v21 }
 0x383   :  { %v1886_v23 = vpop.eup %1885 }
 0x384   :  { %v978_v24 = vrot.slane %v1886_v23, 7  ;;  %v1888_v25 = vpop.eup %1887 }
 0x386   :  { %v979_v26 = vsel %vm959_vm1, %v978_v24, %v1888_v25 }
 0x387   :  { %v981_v27 = vsel %vm962_vm2, %v979_v26, 0.0 }
 0x388   :  { %982 = vadd.xlane.f32.xlu0 %v981_v27 }
 0x415   :  { %v983_v28 = vpop.xlane.xlu0 %982 }
 0x416   :  { %1889 = vrcp.f32 %v983_v28 }
 0x420   :  { %v1890_v29 = vpop.eup %1889 }
 0x421   :  { %v989_v30 = vmul.f32 %v1890_v29, %v1888_v25  ;;  %v986_v31 = vrot.slane %v1890_v29, 1  ;;  %v1531_v25 = vld [vmem:[#allocation20] ss:$0 sm:$0xff] }
 0x423   :  { %v991_v32 = vpack.c.bf16 %v989_v30, %v989_v30  ;;  %v990_v33 = vmul.f32 %v1886_v23, %v986_v31  ;;  %v2242_v23 = vmov -1e+30  }
 0x424   :  { %1163 = vst.msk [vmem:[#allocation3] sm:$0x3] %vm1162_vm3, %v2242_v23 }
 0x425   :  { %1722 = vmatmul.mubr.bf16.vlgmr.msra.gmra.mrb[8].mxu0 %v991_v32  ;;  %v992_v34 = vpack.c.bf16 %v990_v33, %v990_v33  ;;  %v1076_v35 = vrot.slane %v990_v33, 7 }
 0x426   :  { %1604 = vmatpush3.bf16.msra.mxu0 %v1860_v38 }
 0x427   :  { %1742 = vmatmul.mubr.bf16.vlgmr.msra.gmra.mrb[12].mxu1 %v992_v34  ;;  %v1077_v36 = vsel %vm959_vm1, %v1076_v35, %v989_v30  ;;  %1605 = vmatprep.subr.bf16.mxu0 %v1861_v39 }
 0x428   :  { %1079 = vst [vmem:[#allocation26] sm:$0x3] %v1077_v36 }
 0x42a   :  { %1606 = vmatpush3.bf16.msra.mxu0 %v1862_v40 }
 0x42b   :  { %1607 = vmatprep.subr.bf16.mxu0 %v1863_v41 }
 0x42e   :  { %1608 = vmatpush3.bf16.msra.mxu0 %v1864_v42 }
 0x42f   :  { %1609 = vmatprep.subr.bf16.mxu0 %v1865_v43 }
 0x432   :  { %1610 = vmatpush3.bf16.msra.mxu0 %v1866_v44 }
 0x433   :  { %1611 = vmatprep.subr.bf16.mxu0 %v1867_v45 }
 0x436   :  { %1612 = vmatpush3.bf16.msra.mxu0 %v1868_v46 }
 0x437   :  { %1613 = vmatprep.subr.bf16.mxu0 %v1869_v47 }
 0x43a   :  { %1614 = vmatpush3.bf16.msra.mxu0 %v1870_v49 }
 0x43b   :  { %1615 = vmatprep.subr.bf16.mxu0 %v1871_v50 }
 0x43e   :  { %1616 = vmatpush3.bf16.msra.mxu0 %v1872_v51 }
 0x43f   :  { %1617 = vmatprep.subr.bf16.mxu0 %v1873_v52 }
 0x442   :  { %1618 = vmatpush3.bf16.msra.mxu0 %v1874_v7 }
 0x4f8   :  { %v1027_v6 = vpop.f32.mrb[8].mxu0 }
 0x4f9   :  { %v1081_v14 = vpack.c.bf16 %v1027_v6, %v1027_v6  ;;  %v1723_v15 = vpop.f32.mrb[9].mxu0 }
 0x4fa   :  { %v1030_v16 = vpop.f32.mrb[10].mxu0  ;;  %v1067_v17 = vpop.f32.mrb[12].mxu1 }
 0x4fb   :  { %v1091_v18 = vrot.slane %v1081_v14, %v2569_v9  ;;  %v1082_v48 = vpack.c.bf16 %v1067_v17, %v1067_v17  ;;  %v1724_v53 = vpop.f32.mrb[11].mxu0  ;;  %v1743_v54 = vpop.f32.mrb[13].mxu1 }
 0x4fc   :  { %v1070_v55 = vpop.f32.mrb[14].mxu1 }
 0x4fd   :  { %v1098_v56 = vrot.slane %v1091_v18, %v2569_v9  ;;  %v1105_v57 = vrot.slane %v1082_v48, %v2569_v9  ;;  %v1744_v58 = vpop.f32.mrb[15].mxu1 }
 0x4ff   :  { %v1119_v59 = vrot.slane %v1098_v56, %v1118_v19  ;;  %v1112_v60 = vrot.slane %v1105_v57, %v2569_v9 }
 0x501   :  { %v1133_v61 = vrot.slane %v1112_v60, %v1118_v19  ;;  %v1126_v62 = vrot.slane %v1119_v59, %v1118_v19 }
 0x503   :  { %v1140_v63 = vrot.slane %v1133_v61, %v1118_v19  ;;  %v1141_v2 = vunpack.c.l.b16 %v1126_v62 }
 0x505   :  { %v1142_v1 = vunpack.c.l.b16 %v1140_v63 }
 0x507   :  { %v1143_v3 = vrot.slane %v1142_v1, 7 }
 0x509   :  { %v1144_v11 = vsel %vm959_vm1, %v1143_v3, %v1141_v2 }
 0x50a   :  { %v1145_v4 = vpack.c.b16 %v1144_v11, %v1144_v11 }
 0x50c   :  { %v1152_v5 = vrot.slane %v1145_v4, %v2569_v9 }
 0x50e   :  { %1530 = vst.sshfl [vmem:[#allocation2 + $0x1] sm:$0x1 pattern:$0x73625140] %v1152_v5 }
 0x515   :  { %v1532_v12 = vld.sshfl [vmem:[#allocation2] sm:$0x11 pattern:$0x75316420] }
 0x516   :  { %v1213_v20 = vcombine.high %v1532_v12, %v1532_v12  ;;  %v1220_v22 = vrot.slane %v1532_v12, %v2569_v9 }
 0x518   :  { %v1227_v21 = vrot.slane %v1213_v20, %v2569_v9  ;;  %v1367_v9 = vld [vmem:[#allocation3] sm:$0x3] }
 0x51a   :  { %1358 = vmatprep.mubr.bf16.mxu0 %v1227_v21 }
 0x51b   :  { %1359 = vmatmul.mubr.bf16.vlgmr.msra.gmra.mrb[12].mxu0 %v1220_v22 }
 0x5ee   :  { %v1619_v24 = vpop.f32.mrb[12].mxu0 }
 0x5ef   :  { %v1620_v26 = vpop.f32.mrb[13].mxu0 }
 0x5f0   :  { %v1621_v27 = vadd.f32 %v1620_v26, %v1619_v24  ;;  %v1622_v28 = vpop.f32.mrb[14].mxu0 }
 0x5f1   :  { %v1623_v29 = vpop.f32.mrb[15].mxu0 }
 0x5f2   :  { %v1361_v30 = vadd.f32 %v1621_v27, %v1531_v25 }
 0x5f4   :  { %1366 = vst [vmem:[#allocation22] sm:$0x3] %v1361_v30  ;;  %v1369_v31 = vsel %vm962_vm2, %v1361_v30, -inf }
 0x5f5   :  { %1370 = vmax.xlane.f32.xlu1 %v1369_v31 }
 0x682   :  { %v1371_v32 = vpop.xlane.xlu1 %1370 }
 0x683   :  { %v1372_v33 = vmax.f32 %v1367_v9, %v1371_v32 }
 0x685   :  { %v1374_v34 = vsub.f32 %v1367_v9, %v1372_v33  ;;  %1392 = vst.msk [vmem:[#allocation3] sm:$0x3] %vm1162_vm3, %v1372_v33  ;;  %1380 = vperm.xlu1 %1777, %v1372_v33  }
 0x704   :  { %v1381_v35 = vpop.permute.xlu1 %1380 }
 0x705   :  { %v1383_v0 = vsub.f32 %v1361_v30, %v1381_v35 }
 0x707   :  { %v1384_v36 = vmul.f32 1.442695, %v1383_v0 }
 0x709   :  { %1891 = vpow2.f32 %v1384_v36 }
 0x713   :  { %v1892_v37 = vpop.eup %1891 }
 0x714   :  { %v1386_v38 = vsel %vm962_vm2, %v1892_v37, 0.0 }
 0x715   :  { %1387 = vadd.xlane.f32.xlu0 %v1386_v38 }
 0x716   :  { %2128 = shalt.err (!%p2125_p0)
}
 0x717   :  { %s2129_s21 = scalar_lea.hbm %s2687_s10, 32 }
 0x718   :  { %p2130_p1 = scmp.ne.s32.totalorder %s2687_s10, %s2129_s21  ;;  %p2133_p2 = scmp.lt.u32.totalorder %s2129_s21, %s2687_s10 }
 0x71a   :  { %p2135_p3 = pnand %p2133_p2, %p2130_p1 }
 0x71c   :  { %2138 = shalt.err (!%p2135_p3)
}
 0x71d   :  { %1411 = dma.vmem_to_hbm [thread:$0]  %s1409_s24, 32, %s2687_s10, [#allocation7]  }
 0x71e   :  { %s2244_s25 = smov [#allocation26]  }
 0x71f   :  { %s1438_s6 = sshll.u32 %s2244_s25, 4  ;;  %s1439_s6 = int_to_ptr.vmem [resolvable:$true] %s1438_s6 }
 0x720   :  { %s2139_s7 = scalar_lea.vmem %s1439_s6, 32  ;;  %p2144_p5 = scmp.lt.s32.totalorder %s1439_s6, %s1439_s6 }
 0x721   :  { %p2140_p4 = scmp.ne.s32.totalorder %s1439_s6, %s2139_s7  ;;  %p2145_p6 = scmp.lt.s32.totalorder %s2139_s7, %s2139_s7 }
 0x723   :  { %p2146_p7 = por %p2145_p6, %p2144_p5 }
 0x725   :  { %p2147_p8 = pnand %p2146_p7, %p2140_p4 }
 0x727   :  { %2150 = shalt.err (!%p2147_p8)
}
 0x728   :  { %s2151_s14 = scalar_lea.hbm %s2690_s13, 32 }
 0x729   :  { %p2152_p9 = scmp.ne.s32.totalorder %s2690_s13, %s2151_s14  ;;  %p2155_p10 = scmp.lt.u32.totalorder %s2151_s14, %s2690_s13 }
 0x72b   :  { %p2157_p11 = pnand %p2155_p10, %p2152_p9 }
 0x72d   :  { %2160 = shalt.err (!%p2157_p11)
}
 0x72e   :  { %1441 = dma.vmem_to_hbm [thread:$0]  %s1439_s6, 32, %s2690_s13, [#allocation27]   ;;  %v1375_v39 = vmul.f32 1.442695, %v1374_v34  ;;  %v1373_v41 = vld [vmem:[#allocation4] sm:$0x3] }
 0x72f   :  { %s2245_s4 = smov [#allocation23]   ;;  %s2246_s8 = smov [#allocation25]   ;;  %v1396_v49 = vld [vmem:[#allocation3] sm:$0x3] }
 0x730   :  { %1893 = vpow2.f32 %v1375_v39  ;;  %s1418_s28 = sshll.u32 %s2245_s4, 4  ;;  %s1428_s0 = sshll.u32 %s2246_s8, 4  ;;  %s1419_s28 = int_to_ptr.vmem [resolvable:$true] %s1418_s28  ;;  %s1429_s0 = int_to_ptr.vmem [resolvable:$true] %s1428_s0 }
 0x731   :  { %s2161_s13 = scalar_lea.vmem %s1419_s28, 32  ;;  %p2166_p13 = scmp.lt.s32.totalorder %s1419_s28, %s1419_s28 }
 0x732   :  { %p2162_p12 = scmp.ne.s32.totalorder %s1419_s28, %s2161_s13  ;;  %p2167_p0 = scmp.lt.s32.totalorder %s2161_s13, %s2161_s13 }
 0x734   :  { %p2168_p1 = por %p2167_p0, %p2166_p13 }
 0x736   :  { %p2169_p2 = pnand %p2168_p1, %p2162_p12 }
 0x73a   :  { %v1894_v40 = vpop.eup %1893 }
 0x73b   :  { %v1377_v42 = vmul.f32 %v1894_v40, %v1373_v41 }
 0x7a2   :  { %v1388_v43 = vpop.xlane.xlu0 %1387 }
 0x7a3   :  { %v1389_v44 = vadd.f32 %v1388_v43, %v1377_v42 }
 0x7a5   :  { %1391 = vst.msk [vmem:[#allocation4] sm:$0x3] %vm1162_vm3, %v1389_v44 }
 0x7ac   :  { %v1397_v45 = vld [vmem:[#allocation4] sm:$0x3] }
 0x7ad   :  { %1895 = vlog2.f32 %v1397_v45 }
 0x7b7   :  { %v1896_v46 = vpop.eup %1895 }
 0x7b8   :  { %v1399_v47 = vmul.f32 0.6931472, %v1896_v46 }
 0x7ba   :  { %v1400_v50 = vadd.f32 %v1399_v47, %v1396_v49 }
 0x7bc   :  { %1401 = vst.msk [vmem:[#allocation23] sm:$0x3] %vm1162_vm3, %v1400_v50 }
 0x7bd   :  { %2172 = shalt.err (!%p2169_p2)
}
 0x7be   :  { %s2173_s27 = scalar_lea.hbm %s2688_s11, 32 }
 0x7bf   :  { %p2174_p3 = scmp.ne.s32.totalorder %s2688_s11, %s2173_s27  ;;  %p2177_p4 = scmp.lt.u32.totalorder %s2173_s27, %s2688_s11 }
 0x7c1   :  { %p2179_p5 = pnand %p2177_p4, %p2174_p3 }
 0x7c3   :  { %2182 = shalt.err (!%p2179_p5)
}
 0x7c4   :  { %1421 = dma.vmem_to_hbm [thread:$0]  %s1419_s28, 32, %s2688_s11, [#allocation24]  }
 0x7c5   :  { %s2183_s2 = scalar_lea.vmem %s1429_s0, 32  ;;  %p2188_p7 = scmp.lt.s32.totalorder %s1429_s0, %s1429_s0 }
 0x7c6   :  { %p2184_p6 = scmp.ne.s32.totalorder %s1429_s0, %s2183_s2  ;;  %p2189_p8 = scmp.lt.s32.totalorder %s2183_s2, %s2183_s2 }
 0x7c8   :  { %p2190_p9 = por %p2189_p8, %p2188_p7 }
 0x7ca   :  { %p2191_p10 = pnand %p2190_p9, %p2184_p6 }
 0x7cc   :  { %2194 = shalt.err (!%p2191_p10)
}
 0x7cd   :  { %s2195_s25 = scalar_lea.hbm %s2689_s12, 32 }
 0x7ce   :  { %p2196_p11 = scmp.ne.s32.totalorder %s2689_s12, %s2195_s25  ;;  %p2199_p12 = scmp.lt.u32.totalorder %s2195_s25, %s2689_s12 }
 0x7d0   :  { %p2201_p13 = pnand %p2199_p12, %p2196_p11 }
 0x7d2   :  { %2204 = shalt.err (!%p2201_p13)
}
 0x7d3   :  { %1431 = dma.vmem_to_hbm [thread:$0]  %s1429_s0, 32, %s2689_s12, [#allocation24]  }
 0x7d4   :  { %2217 = dma.done.wait [#allocation7], 32  }
 0x7d5   :  { %2218 = vsyncadd [#allocation7], 4294967264 }
 0x7d6   :  { %2219 = dma.done.wait [#allocation24], 64  }
 0x7d7   :  { %2220 = vsyncadd [#allocation24], 4294967232 }
 0x7d8   :  { %2221 = dma.done.wait [#allocation27], 32  }
 0x7d9   :  { %2222 = vsyncadd [#allocation27], 4294967264 }
 0x7da   :  { %1454 = vsyncpa [#allocation6], 1 }
 0x7db   :  { %1455 = vsyncpa [#allocation9], 1 }
 0x7dc   :  { %1456 = vsyncpa [#allocation12], 1 }
 0x7dd   :  { %1457 = vsyncpa [#allocation15], 1 }
 0x7de   :  { %1458 = vsyncpa [#allocation18], 1 }
 0x7df   :  { %1459 = vsyncpa [#allocation21], 1 }
 0x7e0   :  { %1460 = vsyncpa [#allocation7], 1 }
 0x7e1   :  { %1461 = vsyncpa [#allocation24], 1 }
 0x7e2   :  { %1462 = vsyncpa [#allocation27], 1 }

</bundles_post_ra>
